<compile_context>
chip_gen: v7x
topology: tpu7x:2x2x1
jax: 0.10.0
libtpu: 0.0.40
codegen_flags: <defaults>
</compile_context>

<pallas_src>
import math
import functools

import jax
import jax.numpy as jnp
from jax.experimental import pallas as pl
from jax.experimental.pallas import tpu as pltpu


# ----------------------------- tiling helper -----------------------------

def _pick_tile(dim, target, align):
    """Largest tile <= target that divides dim and is a multiple of `align`
    (or the full dim when it is small / no aligned divisor exists)."""
    if dim <= target:
        return dim
    t = (target // align) * align
    while t >= align:
        if dim % t == 0:
            return t
        t -= align
    return dim


# ----------------------------- fused tiled matmul -----------------------------

def _matmul_kernel(*refs, act, fuse_ln, fuse_res, eps):
    idx = 0
    x_ref = refs[idx]; idx += 1
    w_ref = refs[idx]; idx += 1
    b_ref = refs[idx]; idx += 1
    if fuse_ln:
        g_ref = refs[idx]; idx += 1
        bl_ref = refs[idx]; idx += 1
    if fuse_res:
        r_ref = refs[idx]; idx += 1
    o_ref = refs[idx]; idx += 1
    acc_ref = refs[idx]

    k = pl.program_id(2)
    nk = pl.num_programs(2)

    @pl.when(k == 0)
    def _():
        acc_ref[...] = jnp.zeros_like(acc_ref)

    x = x_ref[...]
    if fuse_ln:
        # tk == K is guaranteed by the wrapper, so full rows are visible here.
        xf = x.astype(jnp.float32)
        mean = jnp.mean(xf, axis=-1, keepdims=True)
        xc = xf - mean
        var = jnp.mean(xc * xc, axis=-1, keepdims=True)
        xn = xc * jax.lax.rsqrt(var + eps) * g_ref[...] + bl_ref[...]
        x = xn.astype(x_ref.dtype)          # keep MXU input in native dtype

    acc_ref[...] += jnp.dot(x, w_ref[...], preferred_element_type=jnp.float32)

    @pl.when(k == nk - 1)
    def _():
        y = acc_ref[...] + b_ref[...].astype(jnp.float32)
        if act == "gelu":
            # TODO(synk): PyTorch nn.GELU() default is exact erf; tanh approximation used here.
            y = jax.nn.gelu(y, approximate=True)
        if fuse_res:
            y = y + r_ref[...].astype(jnp.float32)
        o_ref[...] = y.astype(o_ref.dtype)


def fused_linear(x2d, w, b, *, gamma=None, beta=None, residual=None, act="none",
                 eps=1e-5, tm=256, tn=256, tk=512):
    """(M,K)@(K,N)+b with optional fused input-LayerNorm, GELU and residual add."""
    M, K = x2d.shape
    K2, N = w.shape
    assert K == K2
    fuse_ln = gamma is not None
    fuse_res = residual is not None

    tm = _pick_tile(M, tm, 8)
    tn = _pick_tile(N, tn, 128)
    tk = K if fuse_ln else _pick_tile(K, tk, 128)   # LN needs full rows
    grid = (M // tm, N // tn, K // tk)

    in_specs = [
        pl.BlockSpec((tm, tk), lambda i, j, k: (i, k)),
        pl.BlockSpec((tk, tn), lambda i, j, k: (k, j)),
        pl.BlockSpec((1, tn), lambda i, j, k: (0, j)),
    ]
    inputs = [x2d, w, b.reshape(1, N)]
    if fuse_ln:
        in_specs += [pl.BlockSpec((1, tk), lambda i, j, k: (0, k)),
                     pl.BlockSpec((1, tk), lambda i, j, k: (0, k))]
        inputs += [gamma.reshape(1, K), beta.reshape(1, K)]
    if fuse_res:
        in_specs += [pl.BlockSpec((tm, tn), lambda i, j, k: (i, j))]
        inputs += [residual]

    return pl.pallas_call(
        functools.partial(_matmul_kernel, act=act, fuse_ln=fuse_ln,
                          fuse_res=fuse_res, eps=eps),
        out_shape=jax.ShapeDtypeStruct((M, N), x2d.dtype),
        grid_spec=pltpu.PrefetchScalarGridSpec(
            num_scalar_prefetch=0,
            grid=grid,
            in_specs=in_specs,
            out_specs=pl.BlockSpec((tm, tn), lambda i, j, k: (i, j)),
            scratch_shapes=[pltpu.VMEM((tm, tn), jnp.float32)]),
        compiler_params=pltpu.CompilerParams(
            dimension_semantics=("parallel", "parallel", "arbitrary"),
            vmem_limit_bytes=48 * 1024 * 1024),
    )(*inputs)


# ----------------------------- layernorm (row-tiled) -----------------------------

def _layernorm_kernel(x_ref, g_ref, b_ref, o_ref, *, eps):
    x = x_ref[...].astype(jnp.float32)
    mean = jnp.mean(x, axis=-1, keepdims=True)
    xc = x - mean
    var = jnp.mean(xc * xc, axis=-1, keepdims=True)
    y = xc * jax.lax.rsqrt(var + eps) * g_ref[...] + b_ref[...]
    o_ref[...] = y.astype(o_ref.dtype)


def layernorm(x2d, g, b, eps=1e-5, tm=512):
    M, C = x2d.shape
    tm = _pick_tile(M, tm, 8)
    return pl.pallas_call(
        functools.partial(_layernorm_kernel, eps=eps),
        out_shape=jax.ShapeDtypeStruct((M, C), x2d.dtype),
        grid=(M // tm,),
        in_specs=[pl.BlockSpec((tm, C), lambda i: (i, 0)),
                  pl.BlockSpec((1, C), lambda i: (0, 0)),
                  pl.BlockSpec((1, C), lambda i: (0, 0))],
        out_specs=pl.BlockSpec((tm, C), lambda i: (i, 0)),
        compiler_params=pltpu.CompilerParams(dimension_semantics=("parallel",)),
    )(x2d, g.reshape(1, C), b.reshape(1, C))


# ----------------------------- attention (all heads per grid step) -----------------------------

def _attn_body(q_all, k_all, v_all, o_ref, *, n_head, scale, causal):
    """q_all: (T, C), k_all/v_all: (S, C) loaded arrays; writes (1, T, C) o_ref."""
    T, C = q_all.shape
    S = k_all.shape[0]
    hd = C // n_head
    q_all = q_all * scale                       # scale Q, not the (T,S) scores
    if causal:
        qi = jax.lax.broadcasted_iota(jnp.int32, (T, S), 0)
        kj = jax.lax.broadcasted_iota(jnp.int32, (T, S), 1)
        mask = kj <= qi
    dn = (((1,), (1,)), ((), ()))               # contract head_dim (rhs transposed on MXU)
    # TODO(synk): for long sequences this should be a flash-style tq/tk tiled
    # online-softmax kernel; here softmax runs over the full S per block.
    for h in range(n_head):
        lo, hi = h * hd, (h + 1) * hd
        qh = q_all[:, lo:hi]
        kh = k_all[:, lo:hi]
        vh = v_all[:, lo:hi]
        s = jax.lax.dot_general(qh, kh, dn, preferred_element_type=jnp.float32)
        if causal:
            s = jnp.where(mask, s, jnp.float32(-1e30))
        m = jnp.max(s, axis=-1, keepdims=True)
        p = jnp.exp(s - m)
        denom = jnp.sum(p, axis=-1, keepdims=True)
        p = p * pl.reciprocal(denom, approx=True)
        oh = jnp.dot(p.astype(vh.dtype), vh, preferred_element_type=jnp.float32)
        o_ref[0, :, lo:hi] = oh.astype(o_ref.dtype)


def _self_attn_kernel(qkv_ref, o_ref, *, n_head, scale):
    C = o_ref.shape[2]
    qkv = qkv_ref[0]                            # (T, 3C), fused QKV output
    _attn_body(qkv[:, :C], qkv[:, C:2 * C], qkv[:, 2 * C:3 * C], o_ref,
               n_head=n_head, scale=scale, causal=True)


def _cross_attn_kernel(q_ref, kv_ref, o_ref, *, n_head, scale):
    C = o_ref.shape[2]
    q = q_ref[0]                                # (T, C)
    kv = kv_ref[0]                              # (S, 2C), fused KV output
    _attn_body(q, kv[:, :C], kv[:, C:2 * C], o_ref,
               n_head=n_head, scale=scale, causal=False)


def self_attention_heads(qkv3, n_head):
    """qkv3: (B, T, 3C) -> (B, T, C); causal, all heads per grid step."""
    B, T, C3 = qkv3.shape
    C = C3 // 3
    scale = 1.0 / math.sqrt(C // n_head)
    return pl.pallas_call(
        functools.partial(_self_attn_kernel, n_head=n_head, scale=scale),
        out_shape=jax.ShapeDtypeStruct((B, T, C), qkv3.dtype),
        grid=(B,),
        in_specs=[pl.BlockSpec((1, T, C3), lambda b: (b, 0, 0))],
        out_specs=pl.BlockSpec((1, T, C), lambda b: (b, 0, 0)),
        compiler_params=pltpu.CompilerParams(dimension_semantics=("parallel",)),
    )(qkv3)


def cross_attention_heads(q3, kv3, n_head):
    """q3: (B, T, C), kv3: (B, S, 2C) -> (B, T, C); unmasked."""
    B, T, C = q3.shape
    S = kv3.shape[1]
    scale = 1.0 / math.sqrt(C // n_head)
    return pl.pallas_call(
        functools.partial(_cross_attn_kernel, n_head=n_head, scale=scale),
        out_shape=jax.ShapeDtypeStruct((B, T, C), q3.dtype),
        grid=(B,),
        in_specs=[pl.BlockSpec((1, T, C), lambda b: (b, 0, 0)),
                  pl.BlockSpec((1, S, 2 * C), lambda b: (b, 0, 0))],
        out_specs=pl.BlockSpec((1, T, C), lambda b: (b, 0, 0)),
        compiler_params=pltpu.CompilerParams(dimension_semantics=("parallel",)),
    )(q3, kv3)


# ----------------------------- decoder block -----------------------------

def block(x, enc, p, n_head):
    B, T, C = x.shape
    S = enc.shape[1]
    x2 = x.reshape(B * T, C)

    # causal self-attention: LN1 fused into QKV matmul, residual fused into proj
    qkv = fused_linear(x2, p["attn_qkv_w"], p["attn_qkv_b"],
                       gamma=p["ln1_g"], beta=p["ln1_b"])
    attn = self_attention_heads(qkv.reshape(B, T, 3 * C), n_head)
    x2 = fused_linear(attn.reshape(B * T, C), p["attn_proj_w"], p["attn_proj_b"],
                      residual=x2)

    # cross-attention: LNx fused into Q matmul; fused KV from encoder output
    q = fused_linear(x2, p["cross_q_w"], p["cross_q_b"],
                     gamma=p["lnx_g"], beta=p["lnx_b"])
    kv = fused_linear(enc.reshape(B * S, C), p["cross_kv_w"], p["cross_kv_b"])
    cross = cross_attention_heads(q.reshape(B, T, C), kv.reshape(B, S, 2 * C), n_head)
    x2 = fused_linear(cross.reshape(B * T, C), p["cross_proj_w"], p["cross_proj_b"],
                      residual=x2)

    # MLP: LN2 fused into fc (+GELU), residual fused into proj
    h = fused_linear(x2, p["mlp_fc_w"], p["mlp_fc_b"],
                     gamma=p["ln2_g"], beta=p["ln2_b"], act="gelu")
    x2 = fused_linear(h, p["mlp_proj_w"], p["mlp_proj_b"], residual=x2)

    return x2.reshape(B, T, C)


def decoder_forward(x, encoder_output, params, ln_f, n_head, mask=None):
    # mask=None: self-attention is causal, cross-attention is unmasked.
    # TODO(synk): arbitrary padding `mask` argument not supported (only mask=None path).
    for p in params:
        x = block(x, encoder_output, p, n_head)
    B, T, C = x.shape
    x = layernorm(x.reshape(B * T, C), ln_f["g"], ln_f["b"]).reshape(B, T, C)
    return x


# ----------------------------- deterministic params -----------------------------

def init_decoder_params(key, n_layer, n_embd):
    def normal(k, shape, std=0.02):
        return std * jax.random.normal(k, shape, dtype=jnp.float32)

    layer_params = []
    keys = jax.random.split(key, n_layer)
    for l in range(n_layer):
        k = jax.random.split(keys[l], 8)
        p = dict(
            ln1_g=jnp.ones((n_embd,), jnp.float32), ln1_b=jnp.zeros((n_embd,), jnp.float32),
            attn_qkv_w=normal(k[0], (n_embd, 3 * n_embd)),
            attn_qkv_b=jnp.zeros((3 * n_embd,), jnp.float32),
            attn_proj_w=normal(k[1], (n_embd, n_embd)),
            attn_proj_b=jnp.zeros((n_embd,), jnp.float32),
            lnx_g=jnp.ones((n_embd,), jnp.float32), lnx_b=jnp.zeros((n_embd,), jnp.float32),
            cross_q_w=normal(k[2], (n_embd, n_embd)),
            cross_q_b=jnp.zeros((n_embd,), jnp.float32),
            cross_kv_w=normal(k[3], (n_embd, 2 * n_embd)),
            cross_kv_b=jnp.zeros((2 * n_embd,), jnp.float32),
            cross_proj_w=normal(k[4], (n_embd, n_embd)),
            cross_proj_b=jnp.zeros((n_embd,), jnp.float32),
            ln2_g=jnp.ones((n_embd,), jnp.float32), ln2_b=jnp.zeros((n_embd,), jnp.float32),
            mlp_fc_w=normal(k[5], (n_embd, 4 * n_embd)),
            mlp_fc_b=jnp.zeros((4 * n_embd,), jnp.float32),
            mlp_proj_w=normal(k[6], (4 * n_embd, n_embd)),
            mlp_proj_b=jnp.zeros((n_embd,), jnp.float32),
        )
        layer_params.append(p)
    ln_f = dict(g=jnp.ones((n_embd,), jnp.float32), b=jnp.zeros((n_embd,), jnp.float32))
    return layer_params, ln_f


# ----------------------------- main -----------------------------

if __name__ == "__main__":
    # small config: n_layer=2, n_embd=32, n_head=4, bias=True
    B, T, S, C, H, L = 2, 8, 8, 32, 4, 2

    key = jax.random.PRNGKey(0)
    kx, ke, kp = jax.random.split(key, 3)
    x = jax.random.normal(kx, (B, T, C), dtype=jnp.float32)
    encoder_output = jax.random.normal(ke, (B, S, C), dtype=jnp.float32)
    params, ln_f = init_decoder_params(kp, L, C)

    fwd = jax.jit(functools.partial(decoder_forward, n_head=H))
    out = fwd(x, encoder_output, params, ln_f)
    jax.block_until_ready(out)

    assert out.shape == (B, T, C)
    assert bool(jnp.all(jnp.isfinite(out)))
    print("KERNEL_OK")
</pallas_src>

<mosaic_0001>
module attributes {stable_mosaic.version = 11 : i64} {
  func.func @_matmul_kernel(%arg0: i32, %arg1: i32, %arg2: i32, %arg3: memref<16x32xf32, #tpu.memory_space<vmem>>, %arg4: memref<32x32xf32, #tpu.memory_space<vmem>>, %arg5: memref<1x32xf32, #tpu.memory_space<vmem>>, %arg6: memref<1x32xf32, #tpu.memory_space<vmem>>, %arg7: memref<1x32xf32, #tpu.memory_space<vmem>>, %arg8: memref<16x32xf32, #tpu.memory_space<vmem>>, %arg9: memref<16x32xf32, #tpu.memory_space<vmem>>) attributes {dimension_semantics = [#tpu.dimension_semantics<parallel>, #tpu.dimension_semantics<parallel>, #tpu.dimension_semantics<arbitrary>], iteration_bounds = array<i64: 1, 1, 1>, scalar_prefetch = 0 : i64, scratch_operands = 1 : i64, tpu.core_type = #tpu.core_type<tc>, window_params = [{transform_indices = @transform_0, window_bounds = array<i64: 16, 32>}, {transform_indices = @transform_1, window_bounds = array<i64: 32, 32>}, {transform_indices = @transform_2, window_bounds = array<i64: 1, 32>}, {transform_indices = @transform_3, window_bounds = array<i64: 1, 32>}, {transform_indices = @transform_4, window_bounds = array<i64: 1, 32>}, {transform_indices = @transform_5, window_bounds = array<i64: 16, 32>}]} {
    %c0_i32 = arith.constant 0 : i32
    %0 = arith.cmpi eq, %arg2, %c0_i32 : i32
    %1 = arith.extui %0 : i1 to i32
    %c0_i32_0 = arith.constant 0 : i32
    %2 = arith.cmpi ne, %1, %c0_i32_0 : i32
    scf.if %2 {
      %cst_19 = arith.constant 0.000000e+00 : f32
      %34 = vector.broadcast %cst_19 : f32 to vector<16x32xf32>
      %c0_20 = arith.constant 0 : index
      %c0_21 = arith.constant 0 : index
      %35 = vector.load %arg9[%c0_20, %c0_21] : memref<16x32xf32, #tpu.memory_space<vmem>>, vector<16x32xf32>
      tpu.vector_store %arg9[%c0_20, %c0_21], %34 {strides = array<i32>} : memref<16x32xf32, #tpu.memory_space<vmem>>, vector<16x32xf32>,
    } else {
    }
    %c0 = arith.constant 0 : index
    %c0_1 = arith.constant 0 : index
    %3 = vector.load %arg3[%c0, %c0_1] : memref<16x32xf32, #tpu.memory_space<vmem>>, vector<16x32xf32>
    %cst = arith.constant dense<0.000000e+00> : vector<16xf32>
    %4 = vector.multi_reduction <add>, %3, %cst [1] : vector<16x32xf32> to vector<16xf32>
    %5 = vector.shape_cast %4 : vector<16xf32> to vector<16x1xf32>
    %cst_2 = arith.constant 3.200000e+01 : f32
    %6 = vector.broadcast %cst_2 : f32 to vector<16x1xf32>
    %7 = arith.divf %5, %6 : vector<16x1xf32>
    %8 = vector.broadcast %7 : vector<16x1xf32> to vector<16x32xf32>
    %9 = arith.subf %3, %8 : vector<16x32xf32>
    %10 = arith.mulf %9, %9 : vector<16x32xf32>
    %cst_3 = arith.constant dense<0.000000e+00> : vector<16xf32>
    %11 = vector.multi_reduction <add>, %10, %cst_3 [1] : vector<16x32xf32> to vector<16xf32>
    %12 = vector.shape_cast %11 : vector<16xf32> to vector<16x1xf32>
    %cst_4 = arith.constant 3.200000e+01 : f32
    %13 = vector.broadcast %cst_4 : f32 to vector<16x1xf32>
    %14 = arith.divf %12, %13 : vector<16x1xf32>
    %cst_5 = arith.constant 9.99999974E-6 : f32
    %15 = vector.broadcast %cst_5 : f32 to vector<16x1xf32>
    %16 = arith.addf %14, %15 : vector<16x1xf32>
    %17 = math.rsqrt %16 : vector<16x1xf32>
    %18 = vector.broadcast %17 : vector<16x1xf32> to vector<16x32xf32>
    %19 = arith.mulf %9, %18 : vector<16x32xf32>
    %c0_6 = arith.constant 0 : index
    %c0_7 = arith.constant 0 : index
    %20 = vector.load %arg6[%c0_6, %c0_7] : memref<1x32xf32, #tpu.memory_space<vmem>>, vector<1x32xf32>
    %21 = vector.broadcast %20 : vector<1x32xf32> to vector<16x32xf32>
    %22 = arith.mulf %19, %21 : vector<16x32xf32>
    %c0_8 = arith.constant 0 : index
    %c0_9 = arith.constant 0 : index
    %23 = vector.load %arg7[%c0_8, %c0_9] : memref<1x32xf32, #tpu.memory_space<vmem>>, vector<1x32xf32>
    %24 = vector.broadcast %23 : vector<1x32xf32> to vector<16x32xf32>
    %25 = arith.addf %22, %24 : vector<16x32xf32>
    %c0_10 = arith.constant 0 : index
    %c0_11 = arith.constant 0 : index
    %26 = vector.load %arg9[%c0_10, %c0_11] : memref<16x32xf32, #tpu.memory_space<vmem>>, vector<16x32xf32>
    %c0_12 = arith.constant 0 : index
    %c0_13 = arith.constant 0 : index
    %27 = vector.load %arg4[%c0_12, %c0_13] : memref<32x32xf32, #tpu.memory_space<vmem>>, vector<32x32xf32>
    %cst_14 = arith.constant dense<0.000000e+00> : vector<16x32xf32>
    %28 = tpu.matmul %25, %27, %cst_14 {dimension_numbers = #tpu.dot_dimension_numbers<[1], [0], [0], [1], [0, 0, 1, 1], [], []>} : vector<16x32xf32>, vector<32x32xf32>, vector<16x32xf32> -> vector<16x32xf32>
    %29 = arith.addf %26, %28 : vector<16x32xf32>
    %c0_15 = arith.constant 0 : index
    %c0_16 = arith.constant 0 : index
    %30 = vector.load %arg9[%c0_15, %c0_16] : memref<16x32xf32, #tpu.memory_space<vmem>>, vector<16x32xf32>
    tpu.vector_store %arg9[%c0_15, %c0_16], %29 {strides = array<i32>} : memref<16x32xf32, #tpu.memory_space<vmem>>, vector<16x32xf32>,
    %c0_i32_17 = arith.constant 0 : i32
    %31 = arith.cmpi eq, %arg2, %c0_i32_17 : i32
    %32 = arith.extui %31 : i1 to i32
    %c0_i32_18 = arith.constant 0 : i32
    %33 = arith.cmpi ne, %32, %c0_i32_18 : i32
    scf.if %33 {
      %c0_19 = arith.constant 0 : index
      %c0_20 = arith.constant 0 : index
      %34 = vector.load %arg9[%c0_19, %c0_20] : memref<16x32xf32, #tpu.memory_space<vmem>>, vector<16x32xf32>
      %c0_21 = arith.constant 0 : index
      %c0_22 = arith.constant 0 : index
      %35 = vector.load %arg5[%c0_21, %c0_22] : memref<1x32xf32, #tpu.memory_space<vmem>>, vector<1x32xf32>
      %36 = vector.broadcast %35 : vector<1x32xf32> to vector<16x32xf32>
      %37 = arith.addf %34, %36 : vector<16x32xf32>
      %c0_23 = arith.constant 0 : index
      %c0_24 = arith.constant 0 : index
      %38 = vector.load %arg8[%c0_23, %c0_24] : memref<16x32xf32, #tpu.memory_space<vmem>>, vector<16x32xf32>
      tpu.vector_store %arg8[%c0_23, %c0_24], %37 {strides = array<i32>} : memref<16x32xf32, #tpu.memory_space<vmem>>, vector<16x32xf32>,
    } else {
    }
    return
  }
  func.func @transform_0(%arg0: i32, %arg1: i32, %arg2: i32) -> (i32, i32) {
    %c0_i32 = arith.constant 0 : i32
    return %arg0, %arg2 : i32, i32
  }
  func.func @transform_1(%arg0: i32, %arg1: i32, %arg2: i32) -> (i32, i32) {
    %c0_i32 = arith.constant 0 : i32
    return %arg2, %arg1 : i32, i32
  }
  func.func @transform_2(%arg0: i32, %arg1: i32, %arg2: i32) -> (i32, i32) {
    %c0_i32 = arith.constant 0 : i32
    %c0_i32_0 = arith.constant 0 : i32
    return %c0_i32, %arg1 : i32, i32
  }
  func.func @transform_3(%arg0: i32, %arg1: i32, %arg2: i32) -> (i32, i32) {
    %c0_i32 = arith.constant 0 : i32
    %c0_i32_0 = arith.constant 0 : i32
    return %c0_i32, %arg2 : i32, i32
  }
  func.func @transform_4(%arg0: i32, %arg1: i32, %arg2: i32) -> (i32, i32) {
    %c0_i32 = arith.constant 0 : i32
    %c0_i32_0 = arith.constant 0 : i32
    return %c0_i32, %arg2 : i32, i32
  }
  func.func @transform_5(%arg0: i32, %arg1: i32, %arg2: i32) -> (i32, i32) {
    %c0_i32 = arith.constant 0 : i32
    return %arg0, %arg1 : i32, i32
  }
}

module attributes {stable_mosaic.version = 11 : i64} {
  func.func @_matmul_kernel(%arg0: i32, %arg1: i32, %arg2: i32, %arg3: memref<16x32xf32, #tpu.memory_space<vmem>>, %arg4: memref<32x32xf32, #tpu.memory_space<vmem>>, %arg5: memref<1x32xf32, #tpu.memory_space<vmem>>, %arg6: memref<16x32xf32, #tpu.memory_space<vmem>>, %arg7: memref<16x32xf32, #tpu.memory_space<vmem>>, %arg8: memref<16x32xf32, #tpu.memory_space<vmem>>) attributes {dimension_semantics = [#tpu.dimension_semantics<parallel>, #tpu.dimension_semantics<parallel>, #tpu.dimension_semantics<arbitrary>], iteration_bounds = array<i64: 1, 1, 1>, scalar_prefetch = 0 : i64, scratch_operands = 1 : i64, tpu.core_type = #tpu.core_type<tc>, window_params = [{transform_indices = @transform_0, window_bounds = array<i64: 16, 32>}, {transform_indices = @transform_1, window_bounds = array<i64: 32, 32>}, {transform_indices = @transform_2, window_bounds = array<i64: 1, 32>}, {transform_indices = @transform_3, window_bounds = array<i64: 16, 32>}, {transform_indices = @transform_4, window_bounds = array<i64: 16, 32>}]} {
    %c0_i32 = arith.constant 0 : i32
    %0 = arith.cmpi eq, %arg2, %c0_i32 : i32
    %1 = arith.extui %0 : i1 to i32
    %c0_i32_0 = arith.constant 0 : i32
    %2 = arith.cmpi ne, %1, %c0_i32_0 : i32
    scf.if %2 {
      %cst_10 = arith.constant 0.000000e+00 : f32
      %12 = vector.broadcast %cst_10 : f32 to vector<16x32xf32>
      %c0_11 = arith.constant 0 : index
      %c0_12 = arith.constant 0 : index
      %13 = vector.load %arg8[%c0_11, %c0_12] : memref<16x32xf32, #tpu.memory_space<vmem>>, vector<16x32xf32>
      tpu.vector_store %arg8[%c0_11, %c0_12], %12 {strides = array<i32>} : memref<16x32xf32, #tpu.memory_space<vmem>>, vector<16x32xf32>,
    } else {
    }
    %c0 = arith.constant 0 : index
    %c0_1 = arith.constant 0 : index
    %3 = vector.load %arg3[%c0, %c0_1] : memref<16x32xf32, #tpu.memory_space<vmem>>, vector<16x32xf32>
    %c0_2 = arith.constant 0 : index
    %c0_3 = arith.constant 0 : index
    %4 = vector.load %arg8[%c0_2, %c0_3] : memref<16x32xf32, #tpu.memory_space<vmem>>, vector<16x32xf32>
    %c0_4 = arith.constant 0 : index
    %c0_5 = arith.constant 0 : index
    %5 = vector.load %arg4[%c0_4, %c0_5] : memref<32x32xf32, #tpu.memory_space<vmem>>, vector<32x32xf32>
    %cst = arith.constant dense<0.000000e+00> : vector<16x32xf32>
    %6 = tpu.matmul %3, %5, %cst {dimension_numbers = #tpu.dot_dimension_numbers<[1], [0], [0], [1], [0, 0, 1, 1], [], []>} : vector<16x32xf32>, vector<32x32xf32>, vector<16x32xf32> -> vector<16x32xf32>
    %7 = arith.addf %4, %6 : vector<16x32xf32>
    %c0_6 = arith.constant 0 : index
    %c0_7 = arith.constant 0 : index
    %8 = vector.load %arg8[%c0_6, %c0_7] : memref<16x32xf32, #tpu.memory_space<vmem>>, vector<16x32xf32>
    tpu.vector_store %arg8[%c0_6, %c0_7], %7 {strides = array<i32>} : memref<16x32xf32, #tpu.memory_space<vmem>>, vector<16x32xf32>,
    %c0_i32_8 = arith.constant 0 : i32
    %9 = arith.cmpi eq, %arg2, %c0_i32_8 : i32
    %10 = arith.extui %9 : i1 to i32
    %c0_i32_9 = arith.constant 0 : i32
    %11 = arith.cmpi ne, %10, %c0_i32_9 : i32
    scf.if %11 {
      %c0_10 = arith.constant 0 : index
      %c0_11 = arith.constant 0 : index
      %12 = vector.load %arg8[%c0_10, %c0_11] : memref<16x32xf32, #tpu.memory_space<vmem>>, vector<16x32xf32>
      %c0_12 = arith.constant 0 : index
      %c0_13 = arith.constant 0 : index
      %13 = vector.load %arg5[%c0_12, %c0_13] : memref<1x32xf32, #tpu.memory_space<vmem>>, vector<1x32xf32>
      %14 = vector.broadcast %13 : vector<1x32xf32> to vector<16x32xf32>
      %15 = arith.addf %12, %14 : vector<16x32xf32>
      %c0_14 = arith.constant 0 : index
      %c0_15 = arith.constant 0 : index
      %16 = vector.load %arg6[%c0_14, %c0_15] : memref<16x32xf32, #tpu.memory_space<vmem>>, vector<16x32xf32>
      %17 = arith.addf %15, %16 : vector<16x32xf32>
      %c0_16 = arith.constant 0 : index
      %c0_17 = arith.constant 0 : index
      %18 = vector.load %arg7[%c0_16, %c0_17] : memref<16x32xf32, #tpu.memory_space<vmem>>, vector<16x32xf32>
      tpu.vector_store %arg7[%c0_16, %c0_17], %17 {strides = array<i32>} : memref<16x32xf32, #tpu.memory_space<vmem>>, vector<16x32xf32>,
    } else {
    }
    return
  }
  func.func @transform_0(%arg0: i32, %arg1: i32, %arg2: i32) -> (i32, i32) {
    %c0_i32 = arith.constant 0 : i32
    return %arg0, %arg2 : i32, i32
  }
  func.func @transform_1(%arg0: i32, %arg1: i32, %arg2: i32) -> (i32, i32) {
    %c0_i32 = arith.constant 0 : i32
    return %arg2, %arg1 : i32, i32
  }
  func.func @transform_2(%arg0: i32, %arg1: i32, %arg2: i32) -> (i32, i32) {
    %c0_i32 = arith.constant 0 : i32
    %c0_i32_0 = arith.constant 0 : i32
    return %c0_i32, %arg1 : i32, i32
  }
  func.func @transform_3(%arg0: i32, %arg1: i32, %arg2: i32) -> (i32, i32) {
    %c0_i32 = arith.constant 0 : i32
    return %arg0, %arg1 : i32, i32
  }
  func.func @transform_4(%arg0: i32, %arg1: i32, %arg2: i32) -> (i32, i32) {
    %c0_i32 = arith.constant 0 : i32
    return %arg0, %arg1 : i32, i32
  }
}

module attributes {stable_mosaic.version = 11 : i64} {
  func.func @_self_attn_kernel(%arg0: i32, %arg1: memref<1x8x96xf32, #tpu.memory_space<vmem>>, %arg2: memref<1x8x32xf32, #tpu.memory_space<vmem>>) attributes {dimension_semantics = [#tpu.dimension_semantics<parallel>], iteration_bounds = array<i64: 2>, scalar_prefetch = 0 : i64, scratch_operands = 0 : i64, tpu.core_type = #tpu.core_type<tc>, window_params = [{transform_indices = @transform_0, window_bounds = array<i64: 1, 8, 96>}, {transform_indices = @transform_1, window_bounds = array<i64: 1, 8, 32>}]} {
    %c0 = arith.constant 0 : index
    %c0_0 = arith.constant 0 : index
    %c0_1 = arith.constant 0 : index
    %0 = vector.load %arg1[%c0, %c0_0, %c0_1] : memref<1x8x96xf32, #tpu.memory_space<vmem>>, vector<1x8x96xf32>
    %1 = vector.shape_cast %0 : vector<1x8x96xf32> to vector<8x96xf32>
    %2 = vector.extract_strided_slice %1 {offsets = [0, 0], sizes = [8, 32], strides = [1, 1]} : vector<8x96xf32> to vector<8x32xf32>
    %3 = vector.extract_strided_slice %1 {offsets = [0, 32], sizes = [8, 32], strides = [1, 1]} : vector<8x96xf32> to vector<8x32xf32>
    %4 = vector.extract_strided_slice %1 {offsets = [0, 64], sizes = [8, 32], strides = [1, 1]} : vector<8x96xf32> to vector<8x32xf32>
    %cst = arith.constant 0.353553385 : f32
    %5 = vector.broadcast %cst : f32 to vector<8x32xf32>
    %6 = arith.mulf %2, %5 : vector<8x32xf32>
    %7 = tpu.iota {dimensions = array<i32: 0>} : vector<8x8xi32>
    %8 = tpu.iota {dimensions = array<i32: 1>} : vector<8x8xi32>
    %9 = arith.cmpi sle, %8, %7 : vector<8x8xi32>
    %10 = vector.extract_strided_slice %6 {offsets = [0, 0], sizes = [8, 8], strides = [1, 1]} : vector<8x32xf32> to vector<8x8xf32>
    %11 = vector.extract_strided_slice %3 {offsets = [0, 0], sizes = [8, 8], strides = [1, 1]} : vector<8x32xf32> to vector<8x8xf32>
    %12 = vector.extract_strided_slice %4 {offsets = [0, 0], sizes = [8, 8], strides = [1, 1]} : vector<8x32xf32> to vector<8x8xf32>
    %cst_2 = arith.constant dense<0.000000e+00> : vector<8x8xf32>
    %13 = tpu.matmul %10, %11, %cst_2 {dimension_numbers = #tpu.dot_dimension_numbers<[1], [1], [0], [0], [0, 0, 1, 0], [], []>} : vector<8x8xf32>, vector<8x8xf32>, vector<8x8xf32> -> vector<8x8xf32>
    %cst_3 = arith.constant -1.000000e+30 : f32
    %14 = vector.broadcast %cst_3 : f32 to vector<8x8xf32>
    %15 = arith.select %9, %13, %14 : vector<8x8xi1>, vector<8x8xf32>
    %cst_4 = arith.constant dense<0xFF800000> : vector<8xf32>
    %16 = vector.multi_reduction <maximumf>, %15, %cst_4 [1] : vector<8x8xf32> to vector<8xf32>
    %17 = vector.shape_cast %16 : vector<8xf32> to vector<8x1xf32>
    %18 = vector.broadcast %17 : vector<8x1xf32> to vector<8x8xf32>
    %19 = arith.subf %15, %18 : vector<8x8xf32>
    %20 = math.exp %19 : vector<8x8xf32>
    %cst_5 = arith.constant dense<0.000000e+00> : vector<8xf32>
    %21 = vector.multi_reduction <add>, %20, %cst_5 [1] : vector<8x8xf32> to vector<8xf32>
    %22 = vector.shape_cast %21 : vector<8xf32> to vector<8x1xf32>
    %23 = tpu.reciprocal %22 {approx = true} : vector<8x1xf32> -> vector<8x1xf32>
    %24 = vector.broadcast %23 : vector<8x1xf32> to vector<8x8xf32>
    %25 = arith.mulf %20, %24 : vector<8x8xf32>
    %cst_6 = arith.constant dense<0.000000e+00> : vector<8x8xf32>
    %26 = tpu.matmul %25, %12, %cst_6 {dimension_numbers = #tpu.dot_dimension_numbers<[1], [0], [0], [1], [0, 0, 1, 1], [], []>} : vector<8x8xf32>, vector<8x8xf32>, vector<8x8xf32> -> vector<8x8xf32>
    %c0_7 = arith.constant 0 : index
    %c0_8 = arith.constant 0 : index
    %c0_9 = arith.constant 0 : index
    %27 = vector.load %arg2[%c0_7, %c0_8, %c0_9] : memref<1x8x32xf32, #tpu.memory_space<vmem>>, vector<1x8x8xf32>
    %28 = vector.shape_cast %27 : vector<1x8x8xf32> to vector<8x8xf32>
    %29 = vector.shape_cast %26 : vector<8x8xf32> to vector<1x8x8xf32>
    tpu.vector_store %arg2[%c0_7, %c0_8, %c0_9], %29 {strides = array<i32>} : memref<1x8x32xf32, #tpu.memory_space<vmem>>, vector<1x8x8xf32>,
    %30 = vector.extract_strided_slice %6 {offsets = [0, 8], sizes = [8, 8], strides = [1, 1]} : vector<8x32xf32> to vector<8x8xf32>
    %31 = vector.extract_strided_slice %3 {offsets = [0, 8], sizes = [8, 8], strides = [1, 1]} : vector<8x32xf32> to vector<8x8xf32>
    %32 = vector.extract_strided_slice %4 {offsets = [0, 8], sizes = [8, 8], strides = [1, 1]} : vector<8x32xf32> to vector<8x8xf32>
    %cst_10 = arith.constant dense<0.000000e+00> : vector<8x8xf32>
    %33 = tpu.matmul %30, %31, %cst_10 {dimension_numbers = #tpu.dot_dimension_numbers<[1], [1], [0], [0], [0, 0, 1, 0], [], []>} : vector<8x8xf32>, vector<8x8xf32>, vector<8x8xf32> -> vector<8x8xf32>
    %cst_11 = arith.constant -1.000000e+30 : f32
    %34 = vector.broadcast %cst_11 : f32 to vector<8x8xf32>
    %35 = arith.select %9, %33, %34 : vector<8x8xi1>, vector<8x8xf32>
    %cst_12 = arith.constant dense<0xFF800000> : vector<8xf32>
    %36 = vector.multi_reduction <maximumf>, %35, %cst_12 [1] : vector<8x8xf32> to vector<8xf32>
    %37 = vector.shape_cast %36 : vector<8xf32> to vector<8x1xf32>
    %38 = vector.broadcast %37 : vector<8x1xf32> to vector<8x8xf32>
    %39 = arith.subf %35, %38 : vector<8x8xf32>
    %40 = math.exp %39 : vector<8x8xf32>
    %cst_13 = arith.constant dense<0.000000e+00> : vector<8xf32>
    %41 = vector.multi_reduction <add>, %40, %cst_13 [1] : vector<8x8xf32> to vector<8xf32>
    %42 = vector.shape_cast %41 : vector<8xf32> to vector<8x1xf32>
    %43 = tpu.reciprocal %42 {approx = true} : vector<8x1xf32> -> vector<8x1xf32>
    %44 = vector.broadcast %43 : vector<8x1xf32> to vector<8x8xf32>
    %45 = arith.mulf %40, %44 : vector<8x8xf32>
    %cst_14 = arith.constant dense<0.000000e+00> : vector<8x8xf32>
    %46 = tpu.matmul %45, %32, %cst_14 {dimension_numbers = #tpu.dot_dimension_numbers<[1], [0], [0], [1], [0, 0, 1, 1], [], []>} : vector<8x8xf32>, vector<8x8xf32>, vector<8x8xf32> -> vector<8x8xf32>
    %c0_15 = arith.constant 0 : index
    %c0_16 = arith.constant 0 : index
    %c8 = arith.constant 8 : index
    %47 = vector.load %arg2[%c0_15, %c0_16, %c8] : memref<1x8x32xf32, #tpu.memory_space<vmem>>, vector<1x8x8xf32>
    %48 = vector.shape_cast %47 : vector<1x8x8xf32> to vector<8x8xf32>
    %49 = vector.shape_cast %46 : vector<8x8xf32> to vector<1x8x8xf32>
    tpu.vector_store %arg2[%c0_15, %c0_16, %c8], %49 {strides = array<i32>} : memref<1x8x32xf32, #tpu.memory_space<vmem>>, vector<1x8x8xf32>,
    %50 = vector.extract_strided_slice %6 {offsets = [0, 16], sizes = [8, 8], strides = [1, 1]} : vector<8x32xf32> to vector<8x8xf32>
    %51 = vector.extract_strided_slice %3 {offsets = [0, 16], sizes = [8, 8], strides = [1, 1]} : vector<8x32xf32> to vector<8x8xf32>
    %52 = vector.extract_strided_slice %4 {offsets = [0, 16], sizes = [8, 8], strides = [1, 1]} : vector<8x32xf32> to vector<8x8xf32>
    %cst_17 = arith.constant dense<0.000000e+00> : vector<8x8xf32>
    %53 = tpu.matmul %50, %51, %cst_17 {dimension_numbers = #tpu.dot_dimension_numbers<[1], [1], [0], [0], [0, 0, 1, 0], [], []>} : vector<8x8xf32>, vector<8x8xf32>, vector<8x8xf32> -> vector<8x8xf32>
    %cst_18 = arith.constant -1.000000e+30 : f32
    %54 = vector.broadcast %cst_18 : f32 to vector<8x8xf32>
    %55 = arith.select %9, %53, %54 : vector<8x8xi1>, vector<8x8xf32>
    %cst_19 = arith.constant dense<0xFF800000> : vector<8xf32>
    %56 = vector.multi_reduction <maximumf>, %55, %cst_19 [1] : vector<8x8xf32> to vector<8xf32>
    %57 = vector.shape_cast %56 : vector<8xf32> to vector<8x1xf32>
    %58 = vector.broadcast %57 : vector<8x1xf32> to vector<8x8xf32>
    %59 = arith.subf %55, %58 : vector<8x8xf32>
    %60 = math.exp %59 : vector<8x8xf32>
    %cst_20 = arith.constant dense<0.000000e+00> : vector<8xf32>
    %61 = vector.multi_reduction <add>, %60, %cst_20 [1] : vector<8x8xf32> to vector<8xf32>
    %62 = vector.shape_cast %61 : vector<8xf32> to vector<8x1xf32>
    %63 = tpu.reciprocal %62 {approx = true} : vector<8x1xf32> -> vector<8x1xf32>
    %64 = vector.broadcast %63 : vector<8x1xf32> to vector<8x8xf32>
    %65 = arith.mulf %60, %64 : vector<8x8xf32>
    %cst_21 = arith.constant dense<0.000000e+00> : vector<8x8xf32>
    %66 = tpu.matmul %65, %52, %cst_21 {dimension_numbers = #tpu.dot_dimension_numbers<[1], [0], [0], [1], [0, 0, 1, 1], [], []>} : vector<8x8xf32>, vector<8x8xf32>, vector<8x8xf32> -> vector<8x8xf32>
    %c0_22 = arith.constant 0 : index
    %c0_23 = arith.constant 0 : index
    %c16 = arith.constant 16 : index
    %67 = vector.load %arg2[%c0_22, %c0_23, %c16] : memref<1x8x32xf32, #tpu.memory_space<vmem>>, vector<1x8x8xf32>
    %68 = vector.shape_cast %67 : vector<1x8x8xf32> to vector<8x8xf32>
    %69 = vector.shape_cast %66 : vector<8x8xf32> to vector<1x8x8xf32>
    tpu.vector_store %arg2[%c0_22, %c0_23, %c16], %69 {strides = array<i32>} : memref<1x8x32xf32, #tpu.memory_space<vmem>>, vector<1x8x8xf32>,
    %70 = vector.extract_strided_slice %6 {offsets = [0, 24], sizes = [8, 8], strides = [1, 1]} : vector<8x32xf32> to vector<8x8xf32>
    %71 = vector.extract_strided_slice %3 {offsets = [0, 24], sizes = [8, 8], strides = [1, 1]} : vector<8x32xf32> to vector<8x8xf32>
    %72 = vector.extract_strided_slice %4 {offsets = [0, 24], sizes = [8, 8], strides = [1, 1]} : vector<8x32xf32> to vector<8x8xf32>
    %cst_24 = arith.constant dense<0.000000e+00> : vector<8x8xf32>
    %73 = tpu.matmul %70, %71, %cst_24 {dimension_numbers = #tpu.dot_dimension_numbers<[1], [1], [0], [0], [0, 0, 1, 0], [], []>} : vector<8x8xf32>, vector<8x8xf32>, vector<8x8xf32> -> vector<8x8xf32>
    %cst_25 = arith.constant -1.000000e+30 : f32
    %74 = vector.broadcast %cst_25 : f32 to vector<8x8xf32>
    %75 = arith.select %9, %73, %74 : vector<8x8xi1>, vector<8x8xf32>
    %cst_26 = arith.constant dense<0xFF800000> : vector<8xf32>
    %76 = vector.multi_reduction <maximumf>, %75, %cst_26 [1] : vector<8x8xf32> to vector<8xf32>
    %77 = vector.shape_cast %76 : vector<8xf32> to vector<8x1xf32>
    %78 = vector.broadcast %77 : vector<8x1xf32> to vector<8x8xf32>
    %79 = arith.subf %75, %78 : vector<8x8xf32>
    %80 = math.exp %79 : vector<8x8xf32>
    %cst_27 = arith.constant dense<0.000000e+00> : vector<8xf32>
    %81 = vector.multi_reduction <add>, %80, %cst_27 [1] : vector<8x8xf32> to vector<8xf32>
    %82 = vector.shape_cast %81 : vector<8xf32> to vector<8x1xf32>
    %83 = tpu.reciprocal %82 {approx = true} : vector<8x1xf32> -> vector<8x1xf32>
    %84 = vector.broadcast %83 : vector<8x1xf32> to vector<8x8xf32>
    %85 = arith.mulf %80, %84 : vector<8x8xf32>
    %cst_28 = arith.constant dense<0.000000e+00> : vector<8x8xf32>
    %86 = tpu.matmul %85, %72, %cst_28 {dimension_numbers = #tpu.dot_dimension_numbers<[1], [0], [0], [1], [0, 0, 1, 1], [], []>} : vector<8x8xf32>, vector<8x8xf32>, vector<8x8xf32> -> vector<8x8xf32>
    %c0_29 = arith.constant 0 : index
    %c0_30 = arith.constant 0 : index
    %c24 = arith.constant 24 : index
    %87 = vector.load %arg2[%c0_29, %c0_30, %c24] : memref<1x8x32xf32, #tpu.memory_space<vmem>>, vector<1x8x8xf32>
    %88 = vector.shape_cast %87 : vector<1x8x8xf32> to vector<8x8xf32>
    %89 = vector.shape_cast %86 : vector<8x8xf32> to vector<1x8x8xf32>
    tpu.vector_store %arg2[%c0_29, %c0_30, %c24], %89 {strides = array<i32>} : memref<1x8x32xf32, #tpu.memory_space<vmem>>, vector<1x8x8xf32>,
    return
  }
  func.func @transform_0(%arg0: i32) -> (i32, i32, i32) {
    %c0_i32 = arith.constant 0 : i32
    %c0_i32_0 = arith.constant 0 : i32
    %c0_i32_1 = arith.constant 0 : i32
    return %arg0, %c0_i32, %c0_i32_0 : i32, i32, i32
  }
  func.func @transform_1(%arg0: i32) -> (i32, i32, i32) {
    %c0_i32 = arith.constant 0 : i32
    %c0_i32_0 = arith.constant 0 : i32
    %c0_i32_1 = arith.constant 0 : i32
    return %arg0, %c0_i32, %c0_i32_0 : i32, i32, i32
  }
}

module attributes {stable_mosaic.version = 11 : i64} {
  func.func @_matmul_kernel(%arg0: i32, %arg1: i32, %arg2: i32, %arg3: memref<16x32xf32, #tpu.memory_space<vmem>>, %arg4: memref<32x96xf32, #tpu.memory_space<vmem>>, %arg5: memref<1x96xf32, #tpu.memory_space<vmem>>, %arg6: memref<1x32xf32, #tpu.memory_space<vmem>>, %arg7: memref<1x32xf32, #tpu.memory_space<vmem>>, %arg8: memref<16x96xf32, #tpu.memory_space<vmem>>, %arg9: memref<16x96xf32, #tpu.memory_space<vmem>>) attributes {dimension_semantics = [#tpu.dimension_semantics<parallel>, #tpu.dimension_semantics<parallel>, #tpu.dimension_semantics<arbitrary>], iteration_bounds = array<i64: 1, 1, 1>, scalar_prefetch = 0 : i64, scratch_operands = 1 : i64, tpu.core_type = #tpu.core_type<tc>, window_params = [{transform_indices = @transform_0, window_bounds = array<i64: 16, 32>}, {transform_indices = @transform_1, window_bounds = array<i64: 32, 96>}, {transform_indices = @transform_2, window_bounds = array<i64: 1, 96>}, {transform_indices = @transform_3, window_bounds = array<i64: 1, 32>}, {transform_indices = @transform_4, window_bounds = array<i64: 1, 32>}, {transform_indices = @transform_5, window_bounds = array<i64: 16, 96>}]} {
    %c0_i32 = arith.constant 0 : i32
    %0 = arith.cmpi eq, %arg2, %c0_i32 : i32
    %1 = arith.extui %0 : i1 to i32
    %c0_i32_0 = arith.constant 0 : i32
    %2 = arith.cmpi ne, %1, %c0_i32_0 : i32
    scf.if %2 {
      %cst_19 = arith.constant 0.000000e+00 : f32
      %34 = vector.broadcast %cst_19 : f32 to vector<16x96xf32>
      %c0_20 = arith.constant 0 : index
      %c0_21 = arith.constant 0 : index
      %35 = vector.load %arg9[%c0_20, %c0_21] : memref<16x96xf32, #tpu.memory_space<vmem>>, vector<16x96xf32>
      tpu.vector_store %arg9[%c0_20, %c0_21], %34 {strides = array<i32>} : memref<16x96xf32, #tpu.memory_space<vmem>>, vector<16x96xf32>,
    } else {
    }
    %c0 = arith.constant 0 : index
    %c0_1 = arith.constant 0 : index
    %3 = vector.load %arg3[%c0, %c0_1] : memref<16x32xf32, #tpu.memory_space<vmem>>, vector<16x32xf32>
    %cst = arith.constant dense<0.000000e+00> : vector<16xf32>
    %4 = vector.multi_reduction <add>, %3, %cst [1] : vector<16x32xf32> to vector<16xf32>
    %5 = vector.shape_cast %4 : vector<16xf32> to vector<16x1xf32>
    %cst_2 = arith.constant 3.200000e+01 : f32
    %6 = vector.broadcast %cst_2 : f32 to vector<16x1xf32>
    %7 = arith.divf %5, %6 : vector<16x1xf32>
    %8 = vector.broadcast %7 : vector<16x1xf32> to vector<16x32xf32>
    %9 = arith.subf %3, %8 : vector<16x32xf32>
    %10 = arith.mulf %9, %9 : vector<16x32xf32>
    %cst_3 = arith.constant dense<0.000000e+00> : vector<16xf32>
    %11 = vector.multi_reduction <add>, %10, %cst_3 [1] : vector<16x32xf32> to vector<16xf32>
    %12 = vector.shape_cast %11 : vector<16xf32> to vector<16x1xf32>
    %cst_4 = arith.constant 3.200000e+01 : f32
    %13 = vector.broadcast %cst_4 : f32 to vector<16x1xf32>
    %14 = arith.divf %12, %13 : vector<16x1xf32>
    %cst_5 = arith.constant 9.99999974E-6 : f32
    %15 = vector.broadcast %cst_5 : f32 to vector<16x1xf32>
    %16 = arith.addf %14, %15 : vector<16x1xf32>
    %17 = math.rsqrt %16 : vector<16x1xf32>
    %18 = vector.broadcast %17 : vector<16x1xf32> to vector<16x32xf32>
    %19 = arith.mulf %9, %18 : vector<16x32xf32>
    %c0_6 = arith.constant 0 : index
    %c0_7 = arith.constant 0 : index
    %20 = vector.load %arg6[%c0_6, %c0_7] : memref<1x32xf32, #tpu.memory_space<vmem>>, vector<1x32xf32>
    %21 = vector.broadcast %20 : vector<1x32xf32> to vector<16x32xf32>
    %22 = arith.mulf %19, %21 : vector<16x32xf32>
    %c0_8 = arith.constant 0 : index
    %c0_9 = arith.constant 0 : index
    %23 = vector.load %arg7[%c0_8, %c0_9] : memref<1x32xf32, #tpu.memory_space<vmem>>, vector<1x32xf32>
    %24 = vector.broadcast %23 : vector<1x32xf32> to vector<16x32xf32>
    %25 = arith.addf %22, %24 : vector<16x32xf32>
    %c0_10 = arith.constant 0 : index
    %c0_11 = arith.constant 0 : index
    %26 = vector.load %arg9[%c0_10, %c0_11] : memref<16x96xf32, #tpu.memory_space<vmem>>, vector<16x96xf32>
    %c0_12 = arith.constant 0 : index
    %c0_13 = arith.constant 0 : index
    %27 = vector.load %arg4[%c0_12, %c0_13] : memref<32x96xf32, #tpu.memory_space<vmem>>, vector<32x96xf32>
    %cst_14 = arith.constant dense<0.000000e+00> : vector<16x96xf32>
    %28 = tpu.matmul %25, %27, %cst_14 {dimension_numbers = #tpu.dot_dimension_numbers<[1], [0], [0], [1], [0, 0, 1, 1], [], []>} : vector<16x32xf32>, vector<32x96xf32>, vector<16x96xf32> -> vector<16x96xf32>
    %29 = arith.addf %26, %28 : vector<16x96xf32>
    %c0_15 = arith.constant 0 : index
    %c0_16 = arith.constant 0 : index
    %30 = vector.load %arg9[%c0_15, %c0_16] : memref<16x96xf32, #tpu.memory_space<vmem>>, vector<16x96xf32>
    tpu.vector_store %arg9[%c0_15, %c0_16], %29 {strides = array<i32>} : memref<16x96xf32, #tpu.memory_space<vmem>>, vector<16x96xf32>,
    %c0_i32_17 = arith.constant 0 : i32
    %31 = arith.cmpi eq, %arg2, %c0_i32_17 : i32
    %32 = arith.extui %31 : i1 to i32
    %c0_i32_18 = arith.constant 0 : i32
    %33 = arith.cmpi ne, %32, %c0_i32_18 : i32
    scf.if %33 {
      %c0_19 = arith.constant 0 : index
      %c0_20 = arith.constant 0 : index
      %34 = vector.load %arg9[%c0_19, %c0_20] : memref<16x96xf32, #tpu.memory_space<vmem>>, vector<16x96xf32>
      %c0_21 = arith.constant 0 : index
      %c0_22 = arith.constant 0 : index
      %35 = vector.load %arg5[%c0_21, %c0_22] : memref<1x96xf32, #tpu.memory_space<vmem>>, vector<1x96xf32>
      %36 = vector.broadcast %35 : vector<1x96xf32> to vector<16x96xf32>
      %37 = arith.addf %34, %36 : vector<16x96xf32>
      %c0_23 = arith.constant 0 : index
      %c0_24 = arith.constant 0 : index
      %38 = vector.load %arg8[%c0_23, %c0_24] : memref<16x96xf32, #tpu.memory_space<vmem>>, vector<16x96xf32>
      tpu.vector_store %arg8[%c0_23, %c0_24], %37 {strides = array<i32>} : memref<16x96xf32, #tpu.memory_space<vmem>>, vector<16x96xf32>,
    } else {
    }
    return
  }
  func.func @transform_0(%arg0: i32, %arg1: i32, %arg2: i32) -> (i32, i32) {
    %c0_i32 = arith.constant 0 : i32
    return %arg0, %arg2 : i32, i32
  }
  func.func @transform_1(%arg0: i32, %arg1: i32, %arg2: i32) -> (i32, i32) {
    %c0_i32 = arith.constant 0 : i32
    return %arg2, %arg1 : i32, i32
  }
  func.func @transform_2(%arg0: i32, %arg1: i32, %arg2: i32) -> (i32, i32) {
    %c0_i32 = arith.constant 0 : i32
    %c0_i32_0 = arith.constant 0 : i32
    return %c0_i32, %arg1 : i32, i32
  }
  func.func @transform_3(%arg0: i32, %arg1: i32, %arg2: i32) -> (i32, i32) {
    %c0_i32 = arith.constant 0 : i32
    %c0_i32_0 = arith.constant 0 : i32
    return %c0_i32, %arg2 : i32, i32
  }
  func.func @transform_4(%arg0: i32, %arg1: i32, %arg2: i32) -> (i32, i32) {
    %c0_i32 = arith.constant 0 : i32
    %c0_i32_0 = arith.constant 0 : i32
    return %c0_i32, %arg2 : i32, i32
  }
  func.func @transform_5(%arg0: i32, %arg1: i32, %arg2: i32) -> (i32, i32) {
    %c0_i32 = arith.constant 0 : i32
    return %arg0, %arg1 : i32, i32
  }
}

module attributes {stable_mosaic.version = 11 : i64} {
  func.func @_matmul_kernel(%arg0: i32, %arg1: i32, %arg2: i32, %arg3: memref<16x32xf32, #tpu.memory_space<vmem>>, %arg4: memref<32x64xf32, #tpu.memory_space<vmem>>, %arg5: memref<1x64xf32, #tpu.memory_space<vmem>>, %arg6: memref<16x64xf32, #tpu.memory_space<vmem>>, %arg7: memref<16x64xf32, #tpu.memory_space<vmem>>) attributes {dimension_semantics = [#tpu.dimension_semantics<parallel>, #tpu.dimension_semantics<parallel>, #tpu.dimension_semantics<arbitrary>], iteration_bounds = array<i64: 1, 1, 1>, scalar_prefetch = 0 : i64, scratch_operands = 1 : i64, tpu.core_type = #tpu.core_type<tc>, window_params = [{transform_indices = @transform_0, window_bounds = array<i64: 16, 32>}, {transform_indices = @transform_1, window_bounds = array<i64: 32, 64>}, {transform_indices = @transform_2, window_bounds = array<i64: 1, 64>}, {transform_indices = @transform_3, window_bounds = array<i64: 16, 64>}]} {
    %c0_i32 = arith.constant 0 : i32
    %0 = arith.cmpi eq, %arg2, %c0_i32 : i32
    %1 = arith.extui %0 : i1 to i32
    %c0_i32_0 = arith.constant 0 : i32
    %2 = arith.cmpi ne, %1, %c0_i32_0 : i32
    scf.if %2 {
      %cst_10 = arith.constant 0.000000e+00 : f32
      %12 = vector.broadcast %cst_10 : f32 to vector<16x64xf32>
      %c0_11 = arith.constant 0 : index
      %c0_12 = arith.constant 0 : index
      %13 = vector.load %arg7[%c0_11, %c0_12] : memref<16x64xf32, #tpu.memory_space<vmem>>, vector<16x64xf32>
      tpu.vector_store %arg7[%c0_11, %c0_12], %12 {strides = array<i32>} : memref<16x64xf32, #tpu.memory_space<vmem>>, vector<16x64xf32>,
    } else {
    }
    %c0 = arith.constant 0 : index
    %c0_1 = arith.constant 0 : index
    %3 = vector.load %arg3[%c0, %c0_1] : memref<16x32xf32, #tpu.memory_space<vmem>>, vector<16x32xf32>
    %c0_2 = arith.constant 0 : index
    %c0_3 = arith.constant 0 : index
    %4 = vector.load %arg7[%c0_2, %c0_3] : memref<16x64xf32, #tpu.memory_space<vmem>>, vector<16x64xf32>
    %c0_4 = arith.constant 0 : index
    %c0_5 = arith.constant 0 : index
    %5 = vector.load %arg4[%c0_4, %c0_5] : memref<32x64xf32, #tpu.memory_space<vmem>>, vector<32x64xf32>
    %cst = arith.constant dense<0.000000e+00> : vector<16x64xf32>
    %6 = tpu.matmul %3, %5, %cst {dimension_numbers = #tpu.dot_dimension_numbers<[1], [0], [0], [1], [0, 0, 1, 1], [], []>} : vector<16x32xf32>, vector<32x64xf32>, vector<16x64xf32> -> vector<16x64xf32>
    %7 = arith.addf %4, %6 : vector<16x64xf32>
    %c0_6 = arith.constant 0 : index
    %c0_7 = arith.constant 0 : index
    %8 = vector.load %arg7[%c0_6, %c0_7] : memref<16x64xf32, #tpu.memory_space<vmem>>, vector<16x64xf32>
    tpu.vector_store %arg7[%c0_6, %c0_7], %7 {strides = array<i32>} : memref<16x64xf32, #tpu.memory_space<vmem>>, vector<16x64xf32>,
    %c0_i32_8 = arith.constant 0 : i32
    %9 = arith.cmpi eq, %arg2, %c0_i32_8 : i32
    %10 = arith.extui %9 : i1 to i32
    %c0_i32_9 = arith.constant 0 : i32
    %11 = arith.cmpi ne, %10, %c0_i32_9 : i32
    scf.if %11 {
      %c0_10 = arith.constant 0 : index
      %c0_11 = arith.constant 0 : index
      %12 = vector.load %arg7[%c0_10, %c0_11] : memref<16x64xf32, #tpu.memory_space<vmem>>, vector<16x64xf32>
      %c0_12 = arith.constant 0 : index
      %c0_13 = arith.constant 0 : index
      %13 = vector.load %arg5[%c0_12, %c0_13] : memref<1x64xf32, #tpu.memory_space<vmem>>, vector<1x64xf32>
      %14 = vector.broadcast %13 : vector<1x64xf32> to vector<16x64xf32>
      %15 = arith.addf %12, %14 : vector<16x64xf32>
      %c0_14 = arith.constant 0 : index
      %c0_15 = arith.constant 0 : index
      %16 = vector.load %arg6[%c0_14, %c0_15] : memref<16x64xf32, #tpu.memory_space<vmem>>, vector<16x64xf32>
      tpu.vector_store %arg6[%c0_14, %c0_15], %15 {strides = array<i32>} : memref<16x64xf32, #tpu.memory_space<vmem>>, vector<16x64xf32>,
    } else {
    }
    return
  }
  func.func @transform_0(%arg0: i32, %arg1: i32, %arg2: i32) -> (i32, i32) {
    %c0_i32 = arith.constant 0 : i32
    return %arg0, %arg2 : i32, i32
  }
  func.func @transform_1(%arg0: i32, %arg1: i32, %arg2: i32) -> (i32, i32) {
    %c0_i32 = arith.constant 0 : i32
    return %arg2, %arg1 : i32, i32
  }
  func.func @transform_2(%arg0: i32, %arg1: i32, %arg2: i32) -> (i32, i32) {
    %c0_i32 = arith.constant 0 : i32
    %c0_i32_0 = arith.constant 0 : i32
    return %c0_i32, %arg1 : i32, i32
  }
  func.func @transform_3(%arg0: i32, %arg1: i32, %arg2: i32) -> (i32, i32) {
    %c0_i32 = arith.constant 0 : i32
    return %arg0, %arg1 : i32, i32
  }
}

module attributes {stable_mosaic.version = 11 : i64} {
  func.func @_cross_attn_kernel(%arg0: i32, %arg1: memref<1x8x32xf32, #tpu.memory_space<vmem>>, %arg2: memref<1x8x64xf32, #tpu.memory_space<vmem>>, %arg3: memref<1x8x32xf32, #tpu.memory_space<vmem>>) attributes {dimension_semantics = [#tpu.dimension_semantics<parallel>], iteration_bounds = array<i64: 2>, scalar_prefetch = 0 : i64, scratch_operands = 0 : i64, tpu.core_type = #tpu.core_type<tc>, window_params = [{transform_indices = @transform_0, window_bounds = array<i64: 1, 8, 32>}, {transform_indices = @transform_1, window_bounds = array<i64: 1, 8, 64>}, {transform_indices = @transform_2, window_bounds = array<i64: 1, 8, 32>}]} {
    %c0 = arith.constant 0 : index
    %c0_0 = arith.constant 0 : index
    %c0_1 = arith.constant 0 : index
    %0 = vector.load %arg1[%c0, %c0_0, %c0_1] : memref<1x8x32xf32, #tpu.memory_space<vmem>>, vector<1x8x32xf32>
    %1 = vector.shape_cast %0 : vector<1x8x32xf32> to vector<8x32xf32>
    %c0_2 = arith.constant 0 : index
    %c0_3 = arith.constant 0 : index
    %c0_4 = arith.constant 0 : index
    %2 = vector.load %arg2[%c0_2, %c0_3, %c0_4] : memref<1x8x64xf32, #tpu.memory_space<vmem>>, vector<1x8x64xf32>
    %3 = vector.shape_cast %2 : vector<1x8x64xf32> to vector<8x64xf32>
    %4 = vector.extract_strided_slice %3 {offsets = [0, 0], sizes = [8, 32], strides = [1, 1]} : vector<8x64xf32> to vector<8x32xf32>
    %5 = vector.extract_strided_slice %3 {offsets = [0, 32], sizes = [8, 32], strides = [1, 1]} : vector<8x64xf32> to vector<8x32xf32>
    %cst = arith.constant 0.353553385 : f32
    %6 = vector.broadcast %cst : f32 to vector<8x32xf32>
    %7 = arith.mulf %1, %6 : vector<8x32xf32>
    %8 = vector.extract_strided_slice %7 {offsets = [0, 0], sizes = [8, 8], strides = [1, 1]} : vector<8x32xf32> to vector<8x8xf32>
    %9 = vector.extract_strided_slice %4 {offsets = [0, 0], sizes = [8, 8], strides = [1, 1]} : vector<8x32xf32> to vector<8x8xf32>
    %10 = vector.extract_strided_slice %5 {offsets = [0, 0], sizes = [8, 8], strides = [1, 1]} : vector<8x32xf32> to vector<8x8xf32>
    %cst_5 = arith.constant dense<0.000000e+00> : vector<8x8xf32>
    %11 = tpu.matmul %8, %9, %cst_5 {dimension_numbers = #tpu.dot_dimension_numbers<[1], [1], [0], [0], [0, 0, 1, 0], [], []>} : vector<8x8xf32>, vector<8x8xf32>, vector<8x8xf32> -> vector<8x8xf32>
    %cst_6 = arith.constant dense<0xFF800000> : vector<8xf32>
    %12 = vector.multi_reduction <maximumf>, %11, %cst_6 [1] : vector<8x8xf32> to vector<8xf32>
    %13 = vector.shape_cast %12 : vector<8xf32> to vector<8x1xf32>
    %14 = vector.broadcast %13 : vector<8x1xf32> to vector<8x8xf32>
    %15 = arith.subf %11, %14 : vector<8x8xf32>
    %16 = math.exp %15 : vector<8x8xf32>
    %cst_7 = arith.constant dense<0.000000e+00> : vector<8xf32>
    %17 = vector.multi_reduction <add>, %16, %cst_7 [1] : vector<8x8xf32> to vector<8xf32>
    %18 = vector.shape_cast %17 : vector<8xf32> to vector<8x1xf32>
    %19 = tpu.reciprocal %18 {approx = true} : vector<8x1xf32> -> vector<8x1xf32>
    %20 = vector.broadcast %19 : vector<8x1xf32> to vector<8x8xf32>
    %21 = arith.mulf %16, %20 : vector<8x8xf32>
    %cst_8 = arith.constant dense<0.000000e+00> : vector<8x8xf32>
    %22 = tpu.matmul %21, %10, %cst_8 {dimension_numbers = #tpu.dot_dimension_numbers<[1], [0], [0], [1], [0, 0, 1, 1], [], []>} : vector<8x8xf32>, vector<8x8xf32>, vector<8x8xf32> -> vector<8x8xf32>
    %c0_9 = arith.constant 0 : index
    %c0_10 = arith.constant 0 : index
    %c0_11 = arith.constant 0 : index
    %23 = vector.load %arg3[%c0_9, %c0_10, %c0_11] : memref<1x8x32xf32, #tpu.memory_space<vmem>>, vector<1x8x8xf32>
    %24 = vector.shape_cast %23 : vector<1x8x8xf32> to vector<8x8xf32>
    %25 = vector.shape_cast %22 : vector<8x8xf32> to vector<1x8x8xf32>
    tpu.vector_store %arg3[%c0_9, %c0_10, %c0_11], %25 {strides = array<i32>} : memref<1x8x32xf32, #tpu.memory_space<vmem>>, vector<1x8x8xf32>,
    %26 = vector.extract_strided_slice %7 {offsets = [0, 8], sizes = [8, 8], strides = [1, 1]} : vector<8x32xf32> to vector<8x8xf32>
    %27 = vector.extract_strided_slice %4 {offsets = [0, 8], sizes = [8, 8], strides = [1, 1]} : vector<8x32xf32> to vector<8x8xf32>
    %28 = vector.extract_strided_slice %5 {offsets = [0, 8], sizes = [8, 8], strides = [1, 1]} : vector<8x32xf32> to vector<8x8xf32>
    %cst_12 = arith.constant dense<0.000000e+00> : vector<8x8xf32>
    %29 = tpu.matmul %26, %27, %cst_12 {dimension_numbers = #tpu.dot_dimension_numbers<[1], [1], [0], [0], [0, 0, 1, 0], [], []>} : vector<8x8xf32>, vector<8x8xf32>, vector<8x8xf32> -> vector<8x8xf32>
    %cst_13 = arith.constant dense<0xFF800000> : vector<8xf32>
    %30 = vector.multi_reduction <maximumf>, %29, %cst_13 [1] : vector<8x8xf32> to vector<8xf32>
    %31 = vector.shape_cast %30 : vector<8xf32> to vector<8x1xf32>
    %32 = vector.broadcast %31 : vector<8x1xf32> to vector<8x8xf32>
    %33 = arith.subf %29, %32 : vector<8x8xf32>
    %34 = math.exp %33 : vector<8x8xf32>
    %cst_14 = arith.constant dense<0.000000e+00> : vector<8xf32>
    %35 = vector.multi_reduction <add>, %34, %cst_14 [1] : vector<8x8xf32> to vector<8xf32>
    %36 = vector.shape_cast %35 : vector<8xf32> to vector<8x1xf32>
    %37 = tpu.reciprocal %36 {approx = true} : vector<8x1xf32> -> vector<8x1xf32>
    %38 = vector.broadcast %37 : vector<8x1xf32> to vector<8x8xf32>
    %39 = arith.mulf %34, %38 : vector<8x8xf32>
    %cst_15 = arith.constant dense<0.000000e+00> : vector<8x8xf32>
    %40 = tpu.matmul %39, %28, %cst_15 {dimension_numbers = #tpu.dot_dimension_numbers<[1], [0], [0], [1], [0, 0, 1, 1], [], []>} : vector<8x8xf32>, vector<8x8xf32>, vector<8x8xf32> -> vector<8x8xf32>
    %c0_16 = arith.constant 0 : index
    %c0_17 = arith.constant 0 : index
    %c8 = arith.constant 8 : index
    %41 = vector.load %arg3[%c0_16, %c0_17, %c8] : memref<1x8x32xf32, #tpu.memory_space<vmem>>, vector<1x8x8xf32>
    %42 = vector.shape_cast %41 : vector<1x8x8xf32> to vector<8x8xf32>
    %43 = vector.shape_cast %40 : vector<8x8xf32> to vector<1x8x8xf32>
    tpu.vector_store %arg3[%c0_16, %c0_17, %c8], %43 {strides = array<i32>} : memref<1x8x32xf32, #tpu.memory_space<vmem>>, vector<1x8x8xf32>,
    %44 = vector.extract_strided_slice %7 {offsets = [0, 16], sizes = [8, 8], strides = [1, 1]} : vector<8x32xf32> to vector<8x8xf32>
    %45 = vector.extract_strided_slice %4 {offsets = [0, 16], sizes = [8, 8], strides = [1, 1]} : vector<8x32xf32> to vector<8x8xf32>
    %46 = vector.extract_strided_slice %5 {offsets = [0, 16], sizes = [8, 8], strides = [1, 1]} : vector<8x32xf32> to vector<8x8xf32>
    %cst_18 = arith.constant dense<0.000000e+00> : vector<8x8xf32>
    %47 = tpu.matmul %44, %45, %cst_18 {dimension_numbers = #tpu.dot_dimension_numbers<[1], [1], [0], [0], [0, 0, 1, 0], [], []>} : vector<8x8xf32>, vector<8x8xf32>, vector<8x8xf32> -> vector<8x8xf32>
    %cst_19 = arith.constant dense<0xFF800000> : vector<8xf32>
    %48 = vector.multi_reduction <maximumf>, %47, %cst_19 [1] : vector<8x8xf32> to vector<8xf32>
    %49 = vector.shape_cast %48 : vector<8xf32> to vector<8x1xf32>
    %50 = vector.broadcast %49 : vector<8x1xf32> to vector<8x8xf32>
    %51 = arith.subf %47, %50 : vector<8x8xf32>
    %52 = math.exp %51 : vector<8x8xf32>
    %cst_20 = arith.constant dense<0.000000e+00> : vector<8xf32>
    %53 = vector.multi_reduction <add>, %52, %cst_20 [1] : vector<8x8xf32> to vector<8xf32>
    %54 = vector.shape_cast %53 : vector<8xf32> to vector<8x1xf32>
    %55 = tpu.reciprocal %54 {approx = true} : vector<8x1xf32> -> vector<8x1xf32>
    %56 = vector.broadcast %55 : vector<8x1xf32> to vector<8x8xf32>
    %57 = arith.mulf %52, %56 : vector<8x8xf32>
    %cst_21 = arith.constant dense<0.000000e+00> : vector<8x8xf32>
    %58 = tpu.matmul %57, %46, %cst_21 {dimension_numbers = #tpu.dot_dimension_numbers<[1], [0], [0], [1], [0, 0, 1, 1], [], []>} : vector<8x8xf32>, vector<8x8xf32>, vector<8x8xf32> -> vector<8x8xf32>
    %c0_22 = arith.constant 0 : index
    %c0_23 = arith.constant 0 : index
    %c16 = arith.constant 16 : index
    %59 = vector.load %arg3[%c0_22, %c0_23, %c16] : memref<1x8x32xf32, #tpu.memory_space<vmem>>, vector<1x8x8xf32>
    %60 = vector.shape_cast %59 : vector<1x8x8xf32> to vector<8x8xf32>
    %61 = vector.shape_cast %58 : vector<8x8xf32> to vector<1x8x8xf32>
    tpu.vector_store %arg3[%c0_22, %c0_23, %c16], %61 {strides = array<i32>} : memref<1x8x32xf32, #tpu.memory_space<vmem>>, vector<1x8x8xf32>,
    %62 = vector.extract_strided_slice %7 {offsets = [0, 24], sizes = [8, 8], strides = [1, 1]} : vector<8x32xf32> to vector<8x8xf32>
    %63 = vector.extract_strided_slice %4 {offsets = [0, 24], sizes = [8, 8], strides = [1, 1]} : vector<8x32xf32> to vector<8x8xf32>
    %64 = vector.extract_strided_slice %5 {offsets = [0, 24], sizes = [8, 8], strides = [1, 1]} : vector<8x32xf32> to vector<8x8xf32>
    %cst_24 = arith.constant dense<0.000000e+00> : vector<8x8xf32>
    %65 = tpu.matmul %62, %63, %cst_24 {dimension_numbers = #tpu.dot_dimension_numbers<[1], [1], [0], [0], [0, 0, 1, 0], [], []>} : vector<8x8xf32>, vector<8x8xf32>, vector<8x8xf32> -> vector<8x8xf32>
    %cst_25 = arith.constant dense<0xFF800000> : vector<8xf32>
    %66 = vector.multi_reduction <maximumf>, %65, %cst_25 [1] : vector<8x8xf32> to vector<8xf32>
    %67 = vector.shape_cast %66 : vector<8xf32> to vector<8x1xf32>
    %68 = vector.broadcast %67 : vector<8x1xf32> to vector<8x8xf32>
    %69 = arith.subf %65, %68 : vector<8x8xf32>
    %70 = math.exp %69 : vector<8x8xf32>
    %cst_26 = arith.constant dense<0.000000e+00> : vector<8xf32>
    %71 = vector.multi_reduction <add>, %70, %cst_26 [1] : vector<8x8xf32> to vector<8xf32>
    %72 = vector.shape_cast %71 : vector<8xf32> to vector<8x1xf32>
    %73 = tpu.reciprocal %72 {approx = true} : vector<8x1xf32> -> vector<8x1xf32>
    %74 = vector.broadcast %73 : vector<8x1xf32> to vector<8x8xf32>
    %75 = arith.mulf %70, %74 : vector<8x8xf32>
    %cst_27 = arith.constant dense<0.000000e+00> : vector<8x8xf32>
    %76 = tpu.matmul %75, %64, %cst_27 {dimension_numbers = #tpu.dot_dimension_numbers<[1], [0], [0], [1], [0, 0, 1, 1], [], []>} : vector<8x8xf32>, vector<8x8xf32>, vector<8x8xf32> -> vector<8x8xf32>
    %c0_28 = arith.constant 0 : index
    %c0_29 = arith.constant 0 : index
    %c24 = arith.constant 24 : index
    %77 = vector.load %arg3[%c0_28, %c0_29, %c24] : memref<1x8x32xf32, #tpu.memory_space<vmem>>, vector<1x8x8xf32>
    %78 = vector.shape_cast %77 : vector<1x8x8xf32> to vector<8x8xf32>
    %79 = vector.shape_cast %76 : vector<8x8xf32> to vector<1x8x8xf32>
    tpu.vector_store %arg3[%c0_28, %c0_29, %c24], %79 {strides = array<i32>} : memref<1x8x32xf32, #tpu.memory_space<vmem>>, vector<1x8x8xf32>,
    return
  }
  func.func @transform_0(%arg0: i32) -> (i32, i32, i32) {
    %c0_i32 = arith.constant 0 : i32
    %c0_i32_0 = arith.constant 0 : i32
    %c0_i32_1 = arith.constant 0 : i32
    return %arg0, %c0_i32, %c0_i32_0 : i32, i32, i32
  }
  func.func @transform_1(%arg0: i32) -> (i32, i32, i32) {
    %c0_i32 = arith.constant 0 : i32
    %c0_i32_0 = arith.constant 0 : i32
    %c0_i32_1 = arith.constant 0 : i32
    return %arg0, %c0_i32, %c0_i32_0 : i32, i32, i32
  }
  func.func @transform_2(%arg0: i32) -> (i32, i32, i32) {
    %c0_i32 = arith.constant 0 : i32
    %c0_i32_0 = arith.constant 0 : i32
    %c0_i32_1 = arith.constant 0 : i32
    return %arg0, %c0_i32, %c0_i32_0 : i32, i32, i32
  }
}

module attributes {stable_mosaic.version = 11 : i64} {
  func.func @_matmul_kernel(%arg0: i32, %arg1: i32, %arg2: i32, %arg3: memref<16x32xf32, #tpu.memory_space<vmem>>, %arg4: memref<32x128xf32, #tpu.memory_space<vmem>>, %arg5: memref<1x128xf32, #tpu.memory_space<vmem>>, %arg6: memref<1x32xf32, #tpu.memory_space<vmem>>, %arg7: memref<1x32xf32, #tpu.memory_space<vmem>>, %arg8: memref<16x128xf32, #tpu.memory_space<vmem>>, %arg9: memref<16x128xf32, #tpu.memory_space<vmem>>) attributes {dimension_semantics = [#tpu.dimension_semantics<parallel>, #tpu.dimension_semantics<parallel>, #tpu.dimension_semantics<arbitrary>], iteration_bounds = array<i64: 1, 1, 1>, scalar_prefetch = 0 : i64, scratch_operands = 1 : i64, tpu.core_type = #tpu.core_type<tc>, window_params = [{transform_indices = @transform_0, window_bounds = array<i64: 16, 32>}, {transform_indices = @transform_1, window_bounds = array<i64: 32, 128>}, {transform_indices = @transform_2, window_bounds = array<i64: 1, 128>}, {transform_indices = @transform_3, window_bounds = array<i64: 1, 32>}, {transform_indices = @transform_4, window_bounds = array<i64: 1, 32>}, {transform_indices = @transform_5, window_bounds = array<i64: 16, 128>}]} {
    %c0_i32 = arith.constant 0 : i32
    %0 = arith.cmpi eq, %arg2, %c0_i32 : i32
    %1 = arith.extui %0 : i1 to i32
    %c0_i32_0 = arith.constant 0 : i32
    %2 = arith.cmpi ne, %1, %c0_i32_0 : i32
    scf.if %2 {
      %cst_19 = arith.constant 0.000000e+00 : f32
      %34 = vector.broadcast %cst_19 : f32 to vector<16x128xf32>
      %c0_20 = arith.constant 0 : index
      %c0_21 = arith.constant 0 : index
      %35 = vector.load %arg9[%c0_20, %c0_21] : memref<16x128xf32, #tpu.memory_space<vmem>>, vector<16x128xf32>
      tpu.vector_store %arg9[%c0_20, %c0_21], %34 {strides = array<i32>} : memref<16x128xf32, #tpu.memory_space<vmem>>, vector<16x128xf32>,
    } else {
    }
    %c0 = arith.constant 0 : index
    %c0_1 = arith.constant 0 : index
    %3 = vector.load %arg3[%c0, %c0_1] : memref<16x32xf32, #tpu.memory_space<vmem>>, vector<16x32xf32>
    %cst = arith.constant dense<0.000000e+00> : vector<16xf32>
    %4 = vector.multi_reduction <add>, %3, %cst [1] : vector<16x32xf32> to vector<16xf32>
    %5 = vector.shape_cast %4 : vector<16xf32> to vector<16x1xf32>
    %cst_2 = arith.constant 3.200000e+01 : f32
    %6 = vector.broadcast %cst_2 : f32 to vector<16x1xf32>
    %7 = arith.divf %5, %6 : vector<16x1xf32>
    %8 = vector.broadcast %7 : vector<16x1xf32> to vector<16x32xf32>
    %9 = arith.subf %3, %8 : vector<16x32xf32>
    %10 = arith.mulf %9, %9 : vector<16x32xf32>
    %cst_3 = arith.constant dense<0.000000e+00> : vector<16xf32>
    %11 = vector.multi_reduction <add>, %10, %cst_3 [1] : vector<16x32xf32> to vector<16xf32>
    %12 = vector.shape_cast %11 : vector<16xf32> to vector<16x1xf32>
    %cst_4 = arith.constant 3.200000e+01 : f32
    %13 = vector.broadcast %cst_4 : f32 to vector<16x1xf32>
    %14 = arith.divf %12, %13 : vector<16x1xf32>
    %cst_5 = arith.constant 9.99999974E-6 : f32
    %15 = vector.broadcast %cst_5 : f32 to vector<16x1xf32>
    %16 = arith.addf %14, %15 : vector<16x1xf32>
    %17 = math.rsqrt %16 : vector<16x1xf32>
    %18 = vector.broadcast %17 : vector<16x1xf32> to vector<16x32xf32>
    %19 = arith.mulf %9, %18 : vector<16x32xf32>
    %c0_6 = arith.constant 0 : index
    %c0_7 = arith.constant 0 : index
    %20 = vector.load %arg6[%c0_6, %c0_7] : memref<1x32xf32, #tpu.memory_space<vmem>>, vector<1x32xf32>
    %21 = vector.broadcast %20 : vector<1x32xf32> to vector<16x32xf32>
    %22 = arith.mulf %19, %21 : vector<16x32xf32>
    %c0_8 = arith.constant 0 : index
    %c0_9 = arith.constant 0 : index
    %23 = vector.load %arg7[%c0_8, %c0_9] : memref<1x32xf32, #tpu.memory_space<vmem>>, vector<1x32xf32>
    %24 = vector.broadcast %23 : vector<1x32xf32> to vector<16x32xf32>
    %25 = arith.addf %22, %24 : vector<16x32xf32>
    %c0_10 = arith.constant 0 : index
    %c0_11 = arith.constant 0 : index
    %26 = vector.load %arg9[%c0_10, %c0_11] : memref<16x128xf32, #tpu.memory_space<vmem>>, vector<16x128xf32>
    %c0_12 = arith.constant 0 : index
    %c0_13 = arith.constant 0 : index
    %27 = vector.load %arg4[%c0_12, %c0_13] : memref<32x128xf32, #tpu.memory_space<vmem>>, vector<32x128xf32>
    %cst_14 = arith.constant dense<0.000000e+00> : vector<16x128xf32>
    %28 = tpu.matmul %25, %27, %cst_14 {dimension_numbers = #tpu.dot_dimension_numbers<[1], [0], [0], [1], [0, 0, 1, 1], [], []>} : vector<16x32xf32>, vector<32x128xf32>, vector<16x128xf32> -> vector<16x128xf32>
    %29 = arith.addf %26, %28 : vector<16x128xf32>
    %c0_15 = arith.constant 0 : index
    %c0_16 = arith.constant 0 : index
    %30 = vector.load %arg9[%c0_15, %c0_16] : memref<16x128xf32, #tpu.memory_space<vmem>>, vector<16x128xf32>
    tpu.vector_store %arg9[%c0_15, %c0_16], %29 {strides = array<i32>} : memref<16x128xf32, #tpu.memory_space<vmem>>, vector<16x128xf32>,
    %c0_i32_17 = arith.constant 0 : i32
    %31 = arith.cmpi eq, %arg2, %c0_i32_17 : i32
    %32 = arith.extui %31 : i1 to i32
    %c0_i32_18 = arith.constant 0 : i32
    %33 = arith.cmpi ne, %32, %c0_i32_18 : i32
    scf.if %33 {
      %c0_19 = arith.constant 0 : index
      %c0_20 = arith.constant 0 : index
      %34 = vector.load %arg9[%c0_19, %c0_20] : memref<16x128xf32, #tpu.memory_space<vmem>>, vector<16x128xf32>
      %c0_21 = arith.constant 0 : index
      %c0_22 = arith.constant 0 : index
      %35 = vector.load %arg5[%c0_21, %c0_22] : memref<1x128xf32, #tpu.memory_space<vmem>>, vector<1x128xf32>
      %36 = vector.broadcast %35 : vector<1x128xf32> to vector<16x128xf32>
      %37 = arith.addf %34, %36 : vector<16x128xf32>
      %38 = arith.mulf %37, %37 : vector<16x128xf32>
      %39 = arith.mulf %37, %38 : vector<16x128xf32>
      %cst_23 = arith.constant 4.471500e-02 : f32
      %40 = vector.broadcast %cst_23 : f32 to vector<16x128xf32>
      %41 = arith.mulf %40, %39 : vector<16x128xf32>
      %42 = arith.addf %37, %41 : vector<16x128xf32>
      %cst_24 = arith.constant 0.797884583 : f32
      %43 = vector.broadcast %cst_24 : f32 to vector<16x128xf32>
      %44 = arith.mulf %43, %42 : vector<16x128xf32>
      %45 = math.tanh %44 : vector<16x128xf32>
      %cst_25 = arith.constant 1.000000e+00 : f32
      %46 = vector.broadcast %cst_25 : f32 to vector<16x128xf32>
      %47 = arith.addf %46, %45 : vector<16x128xf32>
      %cst_26 = arith.constant 5.000000e-01 : f32
      %48 = vector.broadcast %cst_26 : f32 to vector<16x128xf32>
      %49 = arith.mulf %48, %47 : vector<16x128xf32>
      %50 = arith.mulf %37, %49 : vector<16x128xf32>
      %c0_27 = arith.constant 0 : index
      %c0_28 = arith.constant 0 : index
      %51 = vector.load %arg8[%c0_27, %c0_28] : memref<16x128xf32, #tpu.memory_space<vmem>>, vector<16x128xf32>
      tpu.vector_store %arg8[%c0_27, %c0_28], %50 {strides = array<i32>} : memref<16x128xf32, #tpu.memory_space<vmem>>, vector<16x128xf32>,
    } else {
    }
    return
  }
  func.func @transform_0(%arg0: i32, %arg1: i32, %arg2: i32) -> (i32, i32) {
    %c0_i32 = arith.constant 0 : i32
    return %arg0, %arg2 : i32, i32
  }
  func.func @transform_1(%arg0: i32, %arg1: i32, %arg2: i32) -> (i32, i32) {
    %c0_i32 = arith.constant 0 : i32
    return %arg2, %arg1 : i32, i32
  }
  func.func @transform_2(%arg0: i32, %arg1: i32, %arg2: i32) -> (i32, i32) {
    %c0_i32 = arith.constant 0 : i32
    %c0_i32_0 = arith.constant 0 : i32
    return %c0_i32, %arg1 : i32, i32
  }
  func.func @transform_3(%arg0: i32, %arg1: i32, %arg2: i32) -> (i32, i32) {
    %c0_i32 = arith.constant 0 : i32
    %c0_i32_0 = arith.constant 0 : i32
    return %c0_i32, %arg2 : i32, i32
  }
  func.func @transform_4(%arg0: i32, %arg1: i32, %arg2: i32) -> (i32, i32) {
    %c0_i32 = arith.constant 0 : i32
    %c0_i32_0 = arith.constant 0 : i32
    return %c0_i32, %arg2 : i32, i32
  }
  func.func @transform_5(%arg0: i32, %arg1: i32, %arg2: i32) -> (i32, i32) {
    %c0_i32 = arith.constant 0 : i32
    return %arg0, %arg1 : i32, i32
  }
}

module attributes {stable_mosaic.version = 11 : i64} {
  func.func @_matmul_kernel(%arg0: i32, %arg1: i32, %arg2: i32, %arg3: memref<16x128xf32, #tpu.memory_space<vmem>>, %arg4: memref<128x32xf32, #tpu.memory_space<vmem>>, %arg5: memref<1x32xf32, #tpu.memory_space<vmem>>, %arg6: memref<16x32xf32, #tpu.memory_space<vmem>>, %arg7: memref<16x32xf32, #tpu.memory_space<vmem>>, %arg8: memref<16x32xf32, #tpu.memory_space<vmem>>) attributes {dimension_semantics = [#tpu.dimension_semantics<parallel>, #tpu.dimension_semantics<parallel>, #tpu.dimension_semantics<arbitrary>], iteration_bounds = array<i64: 1, 1, 1>, scalar_prefetch = 0 : i64, scratch_operands = 1 : i64, tpu.core_type = #tpu.core_type<tc>, window_params = [{transform_indices = @transform_0, window_bounds = array<i64: 16, 128>}, {transform_indices = @transform_1, window_bounds = array<i64: 128, 32>}, {transform_indices = @transform_2, window_bounds = array<i64: 1, 32>}, {transform_indices = @transform_3, window_bounds = array<i64: 16, 32>}, {transform_indices = @transform_4, window_bounds = array<i64: 16, 32>}]} {
    %c0_i32 = arith.constant 0 : i32
    %0 = arith.cmpi eq, %arg2, %c0_i32 : i32
    %1 = arith.extui %0 : i1 to i32
    %c0_i32_0 = arith.constant 0 : i32
    %2 = arith.cmpi ne, %1, %c0_i32_0 : i32
    scf.if %2 {
      %cst_10 = arith.constant 0.000000e+00 : f32
      %12 = vector.broadcast %cst_10 : f32 to vector<16x32xf32>
      %c0_11 = arith.constant 0 : index
      %c0_12 = arith.constant 0 : index
      %13 = vector.load %arg8[%c0_11, %c0_12] : memref<16x32xf32, #tpu.memory_space<vmem>>, vector<16x32xf32>
      tpu.vector_store %arg8[%c0_11, %c0_12], %12 {strides = array<i32>} : memref<16x32xf32, #tpu.memory_space<vmem>>, vector<16x32xf32>,
    } else {
    }
    %c0 = arith.constant 0 : index
    %c0_1 = arith.constant 0 : index
    %3 = vector.load %arg3[%c0, %c0_1] : memref<16x128xf32, #tpu.memory_space<vmem>>, vector<16x128xf32>
    %c0_2 = arith.constant 0 : index
    %c0_3 = arith.constant 0 : index
    %4 = vector.load %arg8[%c0_2, %c0_3] : memref<16x32xf32, #tpu.memory_space<vmem>>, vector<16x32xf32>
    %c0_4 = arith.constant 0 : index
    %c0_5 = arith.constant 0 : index
    %5 = vector.load %arg4[%c0_4, %c0_5] : memref<128x32xf32, #tpu.memory_space<vmem>>, vector<128x32xf32>
    %cst = arith.constant dense<0.000000e+00> : vector<16x32xf32>
    %6 = tpu.matmul %3, %5, %cst {dimension_numbers = #tpu.dot_dimension_numbers<[1], [0], [0], [1], [0, 0, 1, 1], [], []>} : vector<16x128xf32>, vector<128x32xf32>, vector<16x32xf32> -> vector<16x32xf32>
    %7 = arith.addf %4, %6 : vector<16x32xf32>
    %c0_6 = arith.constant 0 : index
    %c0_7 = arith.constant 0 : index
    %8 = vector.load %arg8[%c0_6, %c0_7] : memref<16x32xf32, #tpu.memory_space<vmem>>, vector<16x32xf32>
    tpu.vector_store %arg8[%c0_6, %c0_7], %7 {strides = array<i32>} : memref<16x32xf32, #tpu.memory_space<vmem>>, vector<16x32xf32>,
    %c0_i32_8 = arith.constant 0 : i32
    %9 = arith.cmpi eq, %arg2, %c0_i32_8 : i32
    %10 = arith.extui %9 : i1 to i32
    %c0_i32_9 = arith.constant 0 : i32
    %11 = arith.cmpi ne, %10, %c0_i32_9 : i32
    scf.if %11 {
      %c0_10 = arith.constant 0 : index
      %c0_11 = arith.constant 0 : index
      %12 = vector.load %arg8[%c0_10, %c0_11] : memref<16x32xf32, #tpu.memory_space<vmem>>, vector<16x32xf32>
      %c0_12 = arith.constant 0 : index
      %c0_13 = arith.constant 0 : index
      %13 = vector.load %arg5[%c0_12, %c0_13] : memref<1x32xf32, #tpu.memory_space<vmem>>, vector<1x32xf32>
      %14 = vector.broadcast %13 : vector<1x32xf32> to vector<16x32xf32>
      %15 = arith.addf %12, %14 : vector<16x32xf32>
      %c0_14 = arith.constant 0 : index
      %c0_15 = arith.constant 0 : index
      %16 = vector.load %arg6[%c0_14, %c0_15] : memref<16x32xf32, #tpu.memory_space<vmem>>, vector<16x32xf32>
      %17 = arith.addf %15, %16 : vector<16x32xf32>
      %c0_16 = arith.constant 0 : index
      %c0_17 = arith.constant 0 : index
      %18 = vector.load %arg7[%c0_16, %c0_17] : memref<16x32xf32, #tpu.memory_space<vmem>>, vector<16x32xf32>
      tpu.vector_store %arg7[%c0_16, %c0_17], %17 {strides = array<i32>} : memref<16x32xf32, #tpu.memory_space<vmem>>, vector<16x32xf32>,
    } else {
    }
    return
  }
  func.func @transform_0(%arg0: i32, %arg1: i32, %arg2: i32) -> (i32, i32) {
    %c0_i32 = arith.constant 0 : i32
    return %arg0, %arg2 : i32, i32
  }
  func.func @transform_1(%arg0: i32, %arg1: i32, %arg2: i32) -> (i32, i32) {
    %c0_i32 = arith.constant 0 : i32
    return %arg2, %arg1 : i32, i32
  }
  func.func @transform_2(%arg0: i32, %arg1: i32, %arg2: i32) -> (i32, i32) {
    %c0_i32 = arith.constant 0 : i32
    %c0_i32_0 = arith.constant 0 : i32
    return %c0_i32, %arg1 : i32, i32
  }
  func.func @transform_3(%arg0: i32, %arg1: i32, %arg2: i32) -> (i32, i32) {
    %c0_i32 = arith.constant 0 : i32
    return %arg0, %arg1 : i32, i32
  }
  func.func @transform_4(%arg0: i32, %arg1: i32, %arg2: i32) -> (i32, i32) {
    %c0_i32 = arith.constant 0 : i32
    return %arg0, %arg1 : i32, i32
  }
}

module attributes {stable_mosaic.version = 11 : i64} {
  func.func @_layernorm_kernel(%arg0: i32, %arg1: memref<16x32xf32, #tpu.memory_space<vmem>>, %arg2: memref<1x32xf32, #tpu.memory_space<vmem>>, %arg3: memref<1x32xf32, #tpu.memory_space<vmem>>, %arg4: memref<16x32xf32, #tpu.memory_space<vmem>>) attributes {dimension_semantics = [#tpu.dimension_semantics<parallel>], iteration_bounds = array<i64: 1>, scalar_prefetch = 0 : i64, scratch_operands = 0 : i64, tpu.core_type = #tpu.core_type<tc>, window_params = [{transform_indices = @transform_0, window_bounds = array<i64: 16, 32>}, {pipeline_mode = #tpu.pipeline_mode<synchronous>, transform_indices = @transform_1, window_bounds = array<i64: 1, 32>}, {pipeline_mode = #tpu.pipeline_mode<synchronous>, transform_indices = @transform_2, window_bounds = array<i64: 1, 32>}, {transform_indices = @transform_3, window_bounds = array<i64: 16, 32>}]} {
    %c0 = arith.constant 0 : index
    %c0_0 = arith.constant 0 : index
    %0 = vector.load %arg1[%c0, %c0_0] : memref<16x32xf32, #tpu.memory_space<vmem>>, vector<16x32xf32>
    %cst = arith.constant dense<0.000000e+00> : vector<16xf32>
    %1 = vector.multi_reduction <add>, %0, %cst [1] : vector<16x32xf32> to vector<16xf32>
    %2 = vector.shape_cast %1 : vector<16xf32> to vector<16x1xf32>
    %cst_1 = arith.constant 3.200000e+01 : f32
    %3 = vector.broadcast %cst_1 : f32 to vector<16x1xf32>
    %4 = arith.divf %2, %3 : vector<16x1xf32>
    %5 = vector.broadcast %4 : vector<16x1xf32> to vector<16x32xf32>
    %6 = arith.subf %0, %5 : vector<16x32xf32>
    %7 = arith.mulf %6, %6 : vector<16x32xf32>
    %cst_2 = arith.constant dense<0.000000e+00> : vector<16xf32>
    %8 = vector.multi_reduction <add>, %7, %cst_2 [1] : vector<16x32xf32> to vector<16xf32>
    %9 = vector.shape_cast %8 : vector<16xf32> to vector<16x1xf32>
    %cst_3 = arith.constant 3.200000e+01 : f32
    %10 = vector.broadcast %cst_3 : f32 to vector<16x1xf32>
    %11 = arith.divf %9, %10 : vector<16x1xf32>
    %cst_4 = arith.constant 9.99999974E-6 : f32
    %12 = vector.broadcast %cst_4 : f32 to vector<16x1xf32>
    %13 = arith.addf %11, %12 : vector<16x1xf32>
    %14 = math.rsqrt %13 : vector<16x1xf32>
    %15 = vector.broadcast %14 : vector<16x1xf32> to vector<16x32xf32>
    %16 = arith.mulf %6, %15 : vector<16x32xf32>
    %c0_5 = arith.constant 0 : index
    %c0_6 = arith.constant 0 : index
    %17 = vector.load %arg2[%c0_5, %c0_6] : memref<1x32xf32, #tpu.memory_space<vmem>>, vector<1x32xf32>
    %18 = vector.broadcast %17 : vector<1x32xf32> to vector<16x32xf32>
    %19 = arith.mulf %16, %18 : vector<16x32xf32>
    %c0_7 = arith.constant 0 : index
    %c0_8 = arith.constant 0 : index
    %20 = vector.load %arg3[%c0_7, %c0_8] : memref<1x32xf32, #tpu.memory_space<vmem>>, vector<1x32xf32>
    %21 = vector.broadcast %20 : vector<1x32xf32> to vector<16x32xf32>
    %22 = arith.addf %19, %21 : vector<16x32xf32>
    %c0_9 = arith.constant 0 : index
    %c0_10 = arith.constant 0 : index
    %23 = vector.load %arg4[%c0_9, %c0_10] : memref<16x32xf32, #tpu.memory_space<vmem>>, vector<16x32xf32>
    tpu.vector_store %arg4[%c0_9, %c0_10], %22 {strides = array<i32>} : memref<16x32xf32, #tpu.memory_space<vmem>>, vector<16x32xf32>,
    return
  }
  func.func @transform_0(%arg0: i32) -> (i32, i32) {
    %c0_i32 = arith.constant 0 : i32
    %c0_i32_0 = arith.constant 0 : i32
    return %arg0, %c0_i32 : i32, i32
  }
  func.func @transform_1(%arg0: i32) -> (i32, i32) {
    %c0_i32 = arith.constant 0 : i32
    %c0_i32_0 = arith.constant 0 : i32
    %c0_i32_1 = arith.constant 0 : i32
    return %c0_i32, %c0_i32_0 : i32, i32
  }
  func.func @transform_2(%arg0: i32) -> (i32, i32) {
    %c0_i32 = arith.constant 0 : i32
    %c0_i32_0 = arith.constant 0 : i32
    %c0_i32_1 = arith.constant 0 : i32
    return %c0_i32, %c0_i32_0 : i32, i32
  }
  func.func @transform_3(%arg0: i32) -> (i32, i32) {
    %c0_i32 = arith.constant 0 : i32
    %c0_i32_0 = arith.constant 0 : i32
    return %arg0, %c0_i32 : i32, i32
  }
}

</mosaic_0001>

<bundles_post_ra>
// kernel: decoder_forward.21
= control target key start
LH: loop header
LB: loop body
LE: loop exit
PB: predicated region body
PF: predicated region fallthrough
CT: control target
= control target key end

     0   :  { %vm21_vm0 = vcmask 261120   ;;  %v171_v3 = vmov 0.0   ;;  %s238_s1 = inlined_call_operand.vmem [shape: f32[32,32], index: 1, kind: input, shape index: {}]   ;;  %s239_s0 = inlined_call_operand.vmem [shape: f32[16,32], index: 0, kind: input, shape index: {}]   ;;  %s240_s2 = inlined_call_operand.vmem [shape: f32[1,32], index: 2, kind: input, shape index: {}]   ;;  %s241_s3 = inlined_call_operand.vmem [shape: f32[16,32], index: 3, kind: input, shape index: {}]   ;;  %s242_s4 = inlined_call_operand.vmem [shape: f32[16,32], index: 4, kind: output, shape index: {}]  }
   0x1   :  { %v28_v0 = vld [vmem:[%s238_s1] sm:$0xff]  ;;  %v29_v1 = vld [vmem:[%s238_s1 + $0x8] sm:$0xff]  ;;  %v30_v2 = vld [vmem:[%s238_s1 + $0x10] sm:$0xff]  ;;  %23 = vst.msk [vmem:[#allocation2 + $0x8] sm:$0xff] %vm21_vm0, %v171_v3 }
   0x2   :  { %22 = vst.msk [vmem:[#allocation2] sm:$0xff] %vm21_vm0, %v171_v3  ;;  %v162_v4 = vpack.c.bf16 %v29_v1, %v28_v0  ;;  %v31_v5 = vld [vmem:[%s238_s1 + $0x18] sm:$0xff]  ;;  %v24_v6 = vld [vmem:[%s239_s0] sm:$0xff]  ;;  %v25_v8 = vld [vmem:[%s239_s0 + $0x8] sm:$0xff] }
   0x3   :  { %v166_v7 = vpack.c.bf16 %v31_v5, %v30_v2  ;;  %159 = vmatprep.mubr.msk.f32.mxu0 %vm21_vm0, %v24_v6  ;;  %v144_v15 = vld [vmem:[%s240_s2] ss:$0 sm:$0xff]  ;;  %v133_v17 = vld [vmem:[%s241_s3 + $0x8] sm:$0xff] }
   0x4   :  { %163 = vmatprep.subr.bf16.mxu0 %v162_v4  ;;  %v132_v20 = vld [vmem:[%s241_s3] sm:$0xff] }
   0x5   :  { %165 = vmatpush3.bf16.msra.mxu0 %v162_v4 }
   0x6   :  { %167 = vmatprep.subr.bf16.mxu0 %v166_v7 }
   0x8   :  { %v27_v9 = vld [vmem:[#allocation2 + $0x8] sm:$0xff] }
   0x9   :  { %169 = vmatpush3.bf16.msra.mxu0 %v166_v7  ;;  %v26_v10 = vld [vmem:[#allocation2] sm:$0xff] }
   0xc   :  { %160 = vmatmul.mubr.msk.f32.vlgmr.msra.gmra.mrb[0].mxu0 %vm21_vm0, %v25_v8 }
  0xdf   :  { %v161_v11 = vpop.f32.mrb[0].mxu0 }
  0xe0   :  { %v115_v12 = vadd.f32 %v161_v11, %v27_v9  ;;  %v105_v13 = vpop.f32.mrb[1].mxu0 }
  0xe1   :  { %v114_v14 = vadd.f32 %v105_v13, %v26_v10 }
  0xe2   :  { %117 = vst.msk [vmem:[#allocation2 + $0x8] sm:$0xff] %vm21_vm0, %v115_v12 }
  0xe3   :  { %116 = vst.msk [vmem:[#allocation2] sm:$0xff] %vm21_vm0, %v114_v14 }
  0xe9   :  { %v122_v16 = vld [vmem:[#allocation2 + $0x8] sm:$0xff] }
  0xea   :  { %v131_v18 = vadd.f32 %v144_v15, %v122_v16  ;;  %v121_v19 = vld [vmem:[#allocation2] sm:$0xff] }
  0xeb   :  { %v130_v21 = vadd.f32 %v144_v15, %v121_v19 }
  0xec   :  { %v135_v22 = vadd.f32 %v133_v17, %v131_v18 }
  0xed   :  { %v134_v23 = vadd.f32 %v132_v20, %v130_v21 }
  0xee   :  { %137 = vst.msk [vmem:[%s242_s4 + $0x8] sm:$0xff] %vm21_vm0, %v135_v22 }
  0xef   :  { %136 = vst.msk [vmem:[%s242_s4] sm:$0xff] %vm21_vm0, %v134_v23 }

// kernel: decoder_forward.19
= control target key start
LH: loop header
LB: loop body
LE: loop exit
PB: predicated region body
PF: predicated region fallthrough
CT: control target
= control target key end

     0   :  { %vm29_vm0 = vcmask 261120   ;;  %vm24_vm1 = vcmask 785408   ;;  %v222_v20 = vmov 0.0   ;;  %s298_s0 = inlined_call_operand.vmem [shape: f32[16,32], index: 0, kind: input, shape index: {}]   ;;  %s299_s1 = inlined_call_operand.vmem [shape: f32[32,96], index: 1, kind: input, shape index: {}]   ;;  %s300_s3 = inlined_call_operand.vmem [shape: f32[1,32], index: 3, kind: input, shape index: {}]   ;;  %s301_s4 = inlined_call_operand.vmem [shape: f32[1,32], index: 4, kind: input, shape index: {}]   ;;  %s302_s2 = inlined_call_operand.vmem [shape: f32[1,96], index: 2, kind: input, shape index: {}]   ;;  %s303_s5 = inlined_call_operand.vmem [shape: f32[16,96], index: 5, kind: output, shape index: {}]  }
   0x1   :  { %v27_v0 = vld [vmem:[%s298_s0] sm:$0xff]  ;;  %v28_v1 = vld [vmem:[%s298_s0 + $0x8] sm:$0xff]  ;;  %v79_v16 = vld [vmem:[%s299_s1 + $0x10] sm:$0xff]  ;;  %26 = vst.msk [vmem:[#allocation2 + $0x8] sm:$0xff] %vm24_vm1, %v222_v20 }
   0x2   :  { %v30_v2 = vsel %vm29_vm0, %v27_v0, 0.0  ;;  %v33_v3 = vsel %vm29_vm0, %v28_v1, 0.0  ;;  %v77_v14 = vld [vmem:[%s299_s1] sm:$0xff]  ;;  %v78_v15 = vld [vmem:[%s299_s1 + $0x8] sm:$0xff]  ;;  %v80_v18 = vld [vmem:[%s299_s1 + $0x18] sm:$0xff]  ;;  %25 = vst.msk [vmem:[#allocation2] sm:$0xff] %vm24_vm1, %v222_v20 }
   0x3   :  { %31 = vadd.xlane.f32.xlu0 %v30_v2  ;;  %v209_v17 = vpack.c.bf16 %v78_v15, %v77_v14  ;;  %v213_v19 = vpack.c.bf16 %v80_v18, %v79_v16  ;;  %v187_v28 = vld [vmem:[%s300_s3] ss:$0 sm:$0xff] }
   0x4   :  { %v188_v30 = vld [vmem:[%s301_s4] ss:$0 sm:$0xff] }
   0x5   :  { %210 = vmatprep.subr.bf16.mxu0 %v209_v17  ;;  %v191_v43 = vld [vmem:[%s302_s2] ss:$0 sm:$0xff] }
   0x6   :  { %212 = vmatpush3.bf16.msra.mxu0 %v209_v17 }
   0x7   :  { %34 = vadd.xlane.f32.xlu0 %v33_v3  ;;  %214 = vmatprep.subr.bf16.mxu0 %v213_v19 }
   0x8   :  { %v76_v37 = vld [vmem:[#allocation2 + $0x8] sm:$0xff] }
   0x9   :  { %v75_v38 = vld [vmem:[#allocation2] sm:$0xff] }
   0xa   :  { %216 = vmatpush3.bf16.msra.mxu0 %v213_v19 }
  0x90   :  { %v32_v4 = vpop.xlane.xlu0 %31 }
  0x91   :  { %v37_v5 = vmul.f32 0.03125, %v32_v4 }
  0x93   :  { %v39_v6 = vsub.f32 %v27_v0, %v37_v5 }
  0x94   :  { %v35_v7 = vpop.xlane.xlu0 %34 }
  0x95   :  { %v38_v8 = vmul.f32 0.03125, %v35_v7  ;;  %v41_v9 = vmul.f32 %v39_v6, %v39_v6 }
  0x97   :  { %v40_v10 = vsub.f32 %v28_v1, %v38_v8  ;;  %v43_v11 = vsel %vm29_vm0, %v41_v9, 0.0 }
  0x98   :  { %44 = vadd.xlane.f32.xlu1 %v43_v11 }
  0x99   :  { %v42_v12 = vmul.f32 %v40_v10, %v40_v10 }
  0x9b   :  { %v46_v13 = vsel %vm29_vm0, %v42_v12, 0.0 }
  0x9c   :  { %47 = vadd.xlane.f32.xlu1 %v46_v13 }
 0x125   :  { %v45_v21 = vpop.xlane.xlu1 %44 }
 0x126   :  { %v49_v22 = vmul.f32 0.03125, %v45_v21 }
 0x128   :  { %v51_v23 = vadd.f32 1e-05, %v49_v22 }
 0x129   :  { %v48_v24 = vpop.xlane.xlu1 %47 }
 0x12a   :  { %218 = vrsqrt.f32 %v51_v23  ;;  %v50_v25 = vmul.f32 0.03125, %v48_v24 }
 0x12c   :  { %v52_v26 = vadd.f32 1e-05, %v50_v25 }
 0x12e   :  { %220 = vrsqrt.f32 %v52_v26 }
 0x134   :  { %v219_v27 = vpop.eup %218 }
 0x135   :  { %v55_v29 = vmul.f32 %v219_v27, %v39_v6 }
 0x137   :  { %v64_v31 = vmul.f32 %v187_v28, %v55_v29 }
 0x138   :  { %v221_v32 = vpop.eup %220 }
 0x139   :  { %v56_v33 = vmul.f32 %v221_v32, %v40_v10  ;;  %v73_v34 = vadd.f32 %v188_v30, %v64_v31 }
 0x13b   :  { %v65_v35 = vmul.f32 %v187_v28, %v56_v33  ;;  %206 = vmatprep.mubr.msk.f32.mxu0 %vm29_vm0, %v73_v34 }
 0x13d   :  { %v74_v36 = vadd.f32 %v188_v30, %v65_v35 }
 0x13f   :  { %207 = vmatmul.mubr.msk.f32.vlgmr.msra.gmra.mrb[0].mxu0 %vm29_vm0, %v74_v36 }
 0x212   :  { %v208_v39 = vpop.f32.mrb[0].mxu0 }
 0x213   :  { %v163_v40 = vadd.f32 %v208_v39, %v76_v37  ;;  %v153_v41 = vpop.f32.mrb[1].mxu0 }
 0x214   :  { %v162_v42 = vadd.f32 %v153_v41, %v75_v38 }
 0x215   :  { %166 = vst.msk [vmem:[#allocation2 + $0x8] sm:$0xff] %vm24_vm1, %v163_v40 }
 0x216   :  { %165 = vst.msk [vmem:[#allocation2] sm:$0xff] %vm24_vm1, %v162_v42 }
 0x21c   :  { %v171_v44 = vld [vmem:[#allocation2 + $0x8] sm:$0xff] }
 0x21d   :  { %v180_v45 = vadd.f32 %v191_v43, %v171_v44  ;;  %v170_v46 = vld [vmem:[#allocation2] sm:$0xff] }
 0x21e   :  { %v179_v47 = vadd.f32 %v191_v43, %v170_v46 }
 0x21f   :  { %182 = vst.msk [vmem:[%s303_s5 + $0x8] sm:$0xff] %vm24_vm1, %v180_v45 }
 0x220   :  { %181 = vst.msk [vmem:[%s303_s5] sm:$0xff] %vm24_vm1, %v179_v47 }

// kernel: decoder_forward.22
= control target key start
LH: loop header
LB: loop body
LE: loop exit
PB: predicated region body
PF: predicated region fallthrough
CT: control target
= control target key end

     0   :  { %vm24_vm0 = vcmask 261120   ;;  %v221_v20 = vmov 0.0   ;;  %s297_s0 = inlined_call_operand.vmem [shape: f32[16,32], index: 0, kind: input, shape index: {}]   ;;  %s298_s1 = inlined_call_operand.vmem [shape: f32[32,32], index: 1, kind: input, shape index: {}]   ;;  %s299_s3 = inlined_call_operand.vmem [shape: f32[1,32], index: 3, kind: input, shape index: {}]   ;;  %s300_s4 = inlined_call_operand.vmem [shape: f32[1,32], index: 4, kind: input, shape index: {}]   ;;  %s301_s2 = inlined_call_operand.vmem [shape: f32[1,32], index: 2, kind: input, shape index: {}]   ;;  %s302_s5 = inlined_call_operand.vmem [shape: f32[16,32], index: 5, kind: output, shape index: {}]  }
   0x1   :  { %v27_v0 = vld [vmem:[%s297_s0] sm:$0xff]  ;;  %v28_v1 = vld [vmem:[%s297_s0 + $0x8] sm:$0xff]  ;;  %v79_v16 = vld [vmem:[%s298_s1 + $0x10] sm:$0xff]  ;;  %26 = vst.msk [vmem:[#allocation2 + $0x8] sm:$0xff] %vm24_vm0, %v221_v20 }
   0x2   :  { %v30_v2 = vsel %vm24_vm0, %v27_v0, 0.0  ;;  %v33_v3 = vsel %vm24_vm0, %v28_v1, 0.0  ;;  %v77_v14 = vld [vmem:[%s298_s1] sm:$0xff]  ;;  %v78_v15 = vld [vmem:[%s298_s1 + $0x8] sm:$0xff]  ;;  %v80_v18 = vld [vmem:[%s298_s1 + $0x18] sm:$0xff]  ;;  %25 = vst.msk [vmem:[#allocation2] sm:$0xff] %vm24_vm0, %v221_v20 }
   0x3   :  { %31 = vadd.xlane.f32.xlu0 %v30_v2  ;;  %v208_v17 = vpack.c.bf16 %v78_v15, %v77_v14  ;;  %v212_v19 = vpack.c.bf16 %v80_v18, %v79_v16  ;;  %v186_v28 = vld [vmem:[%s299_s3] ss:$0 sm:$0xff] }
   0x4   :  { %v187_v30 = vld [vmem:[%s300_s4] ss:$0 sm:$0xff] }
   0x5   :  { %209 = vmatprep.subr.bf16.mxu0 %v208_v17  ;;  %v190_v43 = vld [vmem:[%s301_s2] ss:$0 sm:$0xff] }
   0x6   :  { %211 = vmatpush3.bf16.msra.mxu0 %v208_v17 }
   0x7   :  { %34 = vadd.xlane.f32.xlu0 %v33_v3  ;;  %213 = vmatprep.subr.bf16.mxu0 %v212_v19 }
   0x8   :  { %v76_v37 = vld [vmem:[#allocation2 + $0x8] sm:$0xff] }
   0x9   :  { %v75_v38 = vld [vmem:[#allocation2] sm:$0xff] }
   0xa   :  { %215 = vmatpush3.bf16.msra.mxu0 %v212_v19 }
  0x90   :  { %v32_v4 = vpop.xlane.xlu0 %31 }
  0x91   :  { %v37_v5 = vmul.f32 0.03125, %v32_v4 }
  0x93   :  { %v39_v6 = vsub.f32 %v27_v0, %v37_v5 }
  0x94   :  { %v35_v7 = vpop.xlane.xlu0 %34 }
  0x95   :  { %v38_v8 = vmul.f32 0.03125, %v35_v7  ;;  %v41_v9 = vmul.f32 %v39_v6, %v39_v6 }
  0x97   :  { %v40_v10 = vsub.f32 %v28_v1, %v38_v8  ;;  %v43_v11 = vsel %vm24_vm0, %v41_v9, 0.0 }
  0x98   :  { %44 = vadd.xlane.f32.xlu1 %v43_v11 }
  0x99   :  { %v42_v12 = vmul.f32 %v40_v10, %v40_v10 }
  0x9b   :  { %v46_v13 = vsel %vm24_vm0, %v42_v12, 0.0 }
  0x9c   :  { %47 = vadd.xlane.f32.xlu1 %v46_v13 }
 0x125   :  { %v45_v21 = vpop.xlane.xlu1 %44 }
 0x126   :  { %v49_v22 = vmul.f32 0.03125, %v45_v21 }
 0x128   :  { %v51_v23 = vadd.f32 1e-05, %v49_v22 }
 0x129   :  { %v48_v24 = vpop.xlane.xlu1 %47 }
 0x12a   :  { %217 = vrsqrt.f32 %v51_v23  ;;  %v50_v25 = vmul.f32 0.03125, %v48_v24 }
 0x12c   :  { %v52_v26 = vadd.f32 1e-05, %v50_v25 }
 0x12e   :  { %219 = vrsqrt.f32 %v52_v26 }
 0x134   :  { %v218_v27 = vpop.eup %217 }
 0x135   :  { %v55_v29 = vmul.f32 %v218_v27, %v39_v6 }
 0x137   :  { %v64_v31 = vmul.f32 %v186_v28, %v55_v29 }
 0x138   :  { %v220_v32 = vpop.eup %219 }
 0x139   :  { %v56_v33 = vmul.f32 %v220_v32, %v40_v10  ;;  %v73_v34 = vadd.f32 %v187_v30, %v64_v31 }
 0x13b   :  { %v65_v35 = vmul.f32 %v186_v28, %v56_v33  ;;  %205 = vmatprep.mubr.msk.f32.mxu0 %vm24_vm0, %v73_v34 }
 0x13d   :  { %v74_v36 = vadd.f32 %v187_v30, %v65_v35 }
 0x13f   :  { %206 = vmatmul.mubr.msk.f32.vlgmr.msra.gmra.mrb[0].mxu0 %vm24_vm0, %v74_v36 }
 0x212   :  { %v207_v39 = vpop.f32.mrb[0].mxu0 }
 0x213   :  { %v163_v40 = vadd.f32 %v207_v39, %v76_v37  ;;  %v153_v41 = vpop.f32.mrb[1].mxu0 }
 0x214   :  { %v162_v42 = vadd.f32 %v153_v41, %v75_v38 }
 0x215   :  { %165 = vst.msk [vmem:[#allocation2 + $0x8] sm:$0xff] %vm24_vm0, %v163_v40 }
 0x216   :  { %164 = vst.msk [vmem:[#allocation2] sm:$0xff] %vm24_vm0, %v162_v42 }
 0x21c   :  { %v170_v44 = vld [vmem:[#allocation2 + $0x8] sm:$0xff] }
 0x21d   :  { %v179_v45 = vadd.f32 %v190_v43, %v170_v44  ;;  %v169_v46 = vld [vmem:[#allocation2] sm:$0xff] }
 0x21e   :  { %v178_v47 = vadd.f32 %v190_v43, %v169_v46 }
 0x21f   :  { %181 = vst.msk [vmem:[%s302_s5 + $0x8] sm:$0xff] %vm24_vm0, %v179_v45 }
 0x220   :  { %180 = vst.msk [vmem:[%s302_s5] sm:$0xff] %vm24_vm0, %v178_v47 }

// kernel: decoder_forward.20
= control target key start
LH: loop header
LB: loop body
LE: loop exit
PB: predicated region body
PF: predicated region fallthrough
CT: control target
= control target key end

     0   :  { %s1007_s6 = smov 0   ;;  %s1097_s0 = inlined_call_operand.vmem [shape: f32[2,8,96], index: 0, kind: input, shape index: {}]   ;;  %s1098_s1 = inlined_call_operand.vmem [shape: f32[2,8,32], index: 1, kind: output, shape index: {}]  }
   0x1 LB: > { %s856_s7 = sadd.s32 4294967295, %s979_s6   ;;  %p860_p0 = scmp.ge.s32.totalorder %s979_s6, 1  ;;  %s979_s6 = sphi %s1007_s6, %s11_s6  }
   0x2   : > { %p86_p1 = scmp.lt.s32.totalorder %s979_s6, 3 }
   0x4   : > { %p87_p2 = pnand %p860_p0, %p86_p1 }
   0x5   : > { %p104_p3 = scmp.lt.s32.totalorder (!%p87_p2), %s856_s7, 1  ;;  %v981_v0 = vmov (!%p87_p2), 0.0   ;;  %vm982_vm0 = vmmov (!%p87_p2), 0   ;;  %s983_s12 = smov (!%p87_p2), 96   ;;  %vm122_vm1 = vcmask (!%p87_p2), 64512   ;;  %v114_v4 = vlaneseq (!%p87_p2) }
   0x6   : > { %90 = sbr.rel (%p87_p2) target bundleno = 1529 (0x5f9), region = 24  ;;  %893 = vmatprep.subr.mxu0 (!%p87_p2), %v981_v0  ;;  %895 = vmatprep.mubr.msk.f32.mxu0 (!%p87_p2), %vm982_vm0, %v981_v0  ;;  %s984_s13 = smov (!%p87_p2), 64   ;;  %vm457_vm3 = vcmask (!%p87_p2), 130112   ;;  %vm629_vm4 = vcmask (!%p87_p2), 195712   ;;  %vm801_vm5 = vcmask (!%p87_p2), 261312  }
   0x7   : > { %898 = vmatprep.subr.mxu1 (!%p87_p2), %v981_v0  ;;  %900 = vmatprep.mubr.msk.f32.mxu1 (!%p87_p2), %vm982_vm0, %v981_v0  ;;  %s985_s14 = smov (!%p87_p2), 88   ;;  %s986_s15 = smov (!%p87_p2), 120   ;;  %v115_v5 = vshrl.u32 (!%p87_p2), %v114_v4, 7  ;;  %v117_v6 = vand.u32 (!%p87_p2), 127, %v114_v4 }
   0x8   : > { %s987_s16 = smov (!%p87_p2), 80   ;;  %s988_s17 = smov (!%p87_p2), 72  }
   0x9   : > { %vm118_vm2 = vcmp.le.s32.totalorder (!%p87_p2), %v117_v6, %v115_v5  ;;  %s989_s18 = smov (!%p87_p2), 112   ;;  %s990_s19 = smov (!%p87_p2), 104  }
   0xa   : > { %s991_s23 = smov (!%p87_p2), 56   ;;  %s992_s24 = smov (!%p87_p2), 40  }
   0xb   : > { %s993_s25 = smov (!%p87_p2), 48   ;;  %s994_s26 = smov (!%p87_p2), 8  }
   0xc   : > { %s995_s27 = smov (!%p87_p2), 16   ;;  %s996_s28 = smov (!%p87_p2), 24  }
   0xd   : > { %s1100_s7 = smov (!%p104_p3, %s856_s7), 1 }
   0xe   : > { %s861_s8 = sshll.u32 %s1100_s7, 3 }
   0xf   : > { %s107_s11 = scalar_lea.vmem %s1097_s0, %s861_s8  ;;  %s1066_s22 = scalar_lea.vmem %s1098_s1, %s861_s8 }
  0x10   : > { %v1029_v1 = vld [vmem:[%s107_s11] sm:$0xff] }
  0x11   : > { %120 = vrot.lane.b32.xlu0 %v1029_v1, %s983_s12  ;;  %v113_v3 = vmul.f32 0.35355338, %v1029_v1  ;;  %210 = vrot.lane.b32.xlu1 %v1029_v1, %s984_s13 }
  0x15   : > { %289 = vrot.lane.b32.xlu1 %v1029_v1, %s985_s14 }
  0x19   : > { %287 = vrot.lane.b32.xlu1 %v113_v3, %s986_s15 }
  0x1d   : > { %461 = vrot.lane.b32.xlu1 %v1029_v1, %s987_s16 }
  0x83   : > { %v121_v2 = vpop.permute.xlu0 %120  ;;  %v211_v11 = vpop.permute.xlu1 %210 }
  0x84   : > { %894 = vmatpush3.xpose.msk.msra.mxu0 %vm122_vm1, %v121_v2  ;;  %899 = vmatpush3.msra.mxu1 %v211_v11 }
  0x85   : > { %908 = vmatprep.subr.mxu0 %v981_v0  ;;  %903 = vmatprep.subr.mxu1 %v981_v0 }
  0x87   : > { %896 = vmatmul.mubr.msk.f32.vlgmr.msra.gmra.mrb[0].mxu0 %vm122_vm1, %v113_v3  ;;  %v290_v17 = vpop.permute.xlu1 %289 }
  0x88   : > { %910 = vmatprep.mubr.msk.f32.mxu0 %vm982_vm0, %v981_v0 }
  0x8b   : > { %v288_v18 = vpop.permute.xlu1 %287 }
  0x8f   : > { %v462_v19 = vpop.permute.xlu1 %461 }
 0x15a   : > { %v194_v7 = vpop.f32.mrb[0].mxu0 }
 0x15b   : > { %v198_v8 = vsel %vm118_vm2, %v194_v7, -1e+30  ;;  %v897_v9 = vpop.f32.mrb[1].mxu0 }
 0x15c   : > { %v199_v10 = vsel %vm122_vm1, %v198_v8, -inf }
 0x15d   : > { %200 = vmax.xlane.f32.xlu0 %v199_v10 }
 0x173   : > { %633 = vrot.lane.b32.xlu0 %v1029_v1, %s988_s17 }
 0x1ea   : > { %v201_v12 = vpop.xlane.xlu0 %200 }
 0x1eb   : > { %v202_v13 = vsub.f32 %v198_v8, %v201_v12 }
 0x1ed   : > { %v203_v14 = vmul.f32 1.442695, %v202_v13 }
 0x1ee   : > { %v634_v24 = vpop.permute.xlu0 %633 }
 0x1ef   : > { %957 = vpow2.f32 %v203_v14 }
 0x1f9   : > { %v958_v15 = vpop.eup %957 }
 0x1fa   : > { %v205_v16 = vsel %vm122_vm1, %v958_v15, 0.0 }
 0x1fb   : > { %206 = vadd.xlane.f32.xlu1 %v205_v16 }
 0x20c   : > { %459 = vrot.lane.b32.xlu1 %v113_v3, %s989_s18 }
 0x210   : > { %631 = vrot.lane.b32.xlu1 %v113_v3, %s990_s19 }
 0x288   : > { %v207_v20 = vpop.xlane.xlu1 %206 }
 0x289   : > { %959 = vrcp.f32 %v207_v20 }
 0x28c   : > { %v460_v23 = vpop.permute.xlu1 %459 }
 0x290   : > { %v632_v25 = vpop.permute.xlu1 %631 }
 0x293   : > { %v960_v21 = vpop.eup %959 }
 0x294   : > { %v209_v22 = vmul.f32 %v960_v21, %v958_v15 }
 0x296   : > { %901 = vmatmul.mubr.msk.f32.vlgmr.msra.gmra.mrb[0].mxu1 %vm122_vm1, %v209_v22 }
 0x297   : > { %904 = vmatpush3.xpose.msk.msra.mxu1 %vm122_vm1, %v290_v17  ;;  %905 = vmatprep.mubr.msk.f32.mxu1 %vm982_vm0, %v981_v0 }
 0x298   : > { %913 = vmatprep.subr.mxu1 %v981_v0 }
 0x29a   : > { %906 = vmatmul.mubr.msk.f32.vlgmr.msra.gmra.mrb[2].mxu1 %vm122_vm1, %v288_v18 }
 0x29b   : > { %914 = vmatpush3.xpose.msk.msra.mxu1 %vm122_vm1, %v462_v19  ;;  %915 = vmatprep.mubr.msk.f32.mxu1 %vm982_vm0, %v981_v0 }
 0x29c   : > { %923 = vmatprep.subr.mxu1 %v981_v0 }
 0x29e   : > { %916 = vmatmul.mubr.msk.f32.vlgmr.msra.gmra.mrb[4].mxu1 %vm122_vm1, %v460_v23 }
 0x29f   : > { %924 = vmatpush3.xpose.msk.msra.mxu1 %vm122_vm1, %v634_v24  ;;  %925 = vmatprep.mubr.msk.f32.mxu1 %vm982_vm0, %v981_v0 }
 0x2a2   : > { %926 = vmatmul.mubr.msk.f32.vlgmr.msra.gmra.mrb[6].mxu1 %vm122_vm1, %v632_v25 }
 0x369   : > { %v282_v26 = vpop.f32.mrb[0].mxu1 }
 0x36a   : > { %286 = vst.msk [vmem:[%s1066_s22] sm:$0xff] %vm122_vm1, %v282_v26  ;;  %v902_v27 = vpop.f32.mrb[1].mxu1 }
 0x36d   : > { %v361_v28 = vpop.f32.mrb[2].mxu1 }
 0x36e   : > { %v365_v29 = vsel %vm118_vm2, %v361_v28, -1e+30  ;;  %v907_v30 = vpop.f32.mrb[3].mxu1 }
 0x36f   : > { %v366_v31 = vsel %vm122_vm1, %v365_v29, -inf }
 0x370   : > { %367 = vmax.xlane.f32.xlu1 %v366_v31 }
 0x371   : > { %v533_v32 = vpop.f32.mrb[4].mxu1 }
 0x372   : > { %v537_v33 = vsel %vm118_vm2, %v533_v32, -1e+30  ;;  %v917_v34 = vpop.f32.mrb[5].mxu1 }
 0x373   : > { %v538_v35 = vsel %vm122_vm1, %v537_v33, -inf }
 0x374   : > { %539 = vmax.xlane.f32.xlu0 %v538_v35 }
 0x375   : > { %v705_v36 = vpop.f32.mrb[6].mxu1 }
 0x376   : > { %v709_v37 = vsel %vm118_vm2, %v705_v36, -1e+30  ;;  %v927_v38 = vpop.f32.mrb[7].mxu1 }
 0x377   : > { %v710_v39 = vsel %vm122_vm1, %v709_v37, -inf }
 0x378   : > { %711 = vmax.xlane.f32.xlu1 %v710_v39 }
 0x389   : > { %377 = vrot.lane.b32.xlu1 %v1029_v1, %s991_s23 }
 0x3fd   : > { %v368_v40 = vpop.xlane.xlu1 %367 }
 0x3fe   : > { %v369_v41 = vsub.f32 %v365_v29, %v368_v40 }
 0x400   : > { %v370_v42 = vmul.f32 1.442695, %v369_v41 }
 0x401   : > { %v540_v43 = vpop.xlane.xlu0 %539 }
 0x402   : > { %961 = vpow2.f32 %v370_v42  ;;  %v541_v44 = vsub.f32 %v537_v33, %v540_v43 }
 0x404   : > { %v542_v45 = vmul.f32 1.442695, %v541_v44 }
 0x405   : > { %v712_v46 = vpop.xlane.xlu1 %711 }
 0x406   : > { %963 = vpow2.f32 %v542_v45  ;;  %v713_v47 = vsub.f32 %v709_v37, %v712_v46 }
 0x408   : > { %v714_v48 = vmul.f32 1.442695, %v713_v47 }
 0x409   : > { %v378_v49 = vpop.permute.xlu1 %377 }
 0x40a   : > { %965 = vpow2.f32 %v714_v48  ;;  %909 = vmatpush3.msra.mxu0 %v378_v49 }
 0x40b   : > { %918 = vmatprep.subr.mxu0 %v981_v0 }
 0x40c   : > { %v962_v50 = vpop.eup %961 }
 0x40d   : > { %v372_v51 = vsel %vm122_vm1, %v962_v50, 0.0 }
 0x40e   : > { %373 = vadd.xlane.f32.xlu1 %v372_v51 }
 0x410   : > { %v964_v52 = vpop.eup %963 }
 0x411   : > { %v544_v53 = vsel %vm122_vm1, %v964_v52, 0.0 }
 0x412   : > { %545 = vadd.xlane.f32.xlu1 %v544_v53 }
 0x414   : > { %v966_v54 = vpop.eup %965 }
 0x415   : > { %v716_v55 = vsel %vm122_vm1, %v966_v54, 0.0 }
 0x416   : > { %717 = vadd.xlane.f32.xlu0 %v716_v55 }
 0x423   : > { %721 = vrot.lane.b32.xlu1 %v1029_v1, %s992_s24 }
 0x42c   : > { %549 = vrot.lane.b32.xlu0 %v1029_v1, %s993_s25 }
 0x49b   : > { %v374_v56 = vpop.xlane.xlu1 %373 }
 0x49c   : > { %967 = vrcp.f32 %v374_v56 }
 0x49f   : > { %v546_v57 = vpop.xlane.xlu1 %545 }
 0x4a0   : > { %969 = vrcp.f32 %v546_v57 }
 0x4a3   : > { %v718_v58 = vpop.xlane.xlu0 %717  ;;  %v722_v2 = vpop.permute.xlu1 %721 }
 0x4a4   : > { %971 = vrcp.f32 %v718_v58 }
 0x4a6   : > { %v968_v59 = vpop.eup %967 }
 0x4a7   : > { %v376_v60 = vmul.f32 %v968_v59, %v962_v50  ;;  %v550_v61 = vpop.permute.xlu0 %549 }
 0x4a9   : > { %911 = vmatmul.mubr.msk.f32.vlgmr.msra.gmra.mrb[2].mxu0 %vm122_vm1, %v376_v60 }
 0x4aa   : > { %v970_v62 = vpop.eup %969  ;;  %919 = vmatpush3.msra.mxu0 %v550_v61  ;;  %920 = vmatprep.mubr.msk.f32.mxu0 %vm982_vm0, %v981_v0 }
 0x4ab   : > { %v548_v63 = vmul.f32 %v970_v62, %v964_v52  ;;  %928 = vmatprep.subr.mxu0 %v981_v0 }
 0x4ad   : > { %921 = vmatmul.mubr.msk.f32.vlgmr.msra.gmra.mrb[4].mxu0 %vm122_vm1, %v548_v63 }
 0x4ae   : > { %v972_v1 = vpop.eup %971  ;;  %929 = vmatpush3.msra.mxu0 %v722_v2  ;;  %930 = vmatprep.mubr.msk.f32.mxu0 %vm982_vm0, %v981_v0 }
 0x4af   : > { %v720_v3 = vmul.f32 %v972_v1, %v966_v54 }
 0x4b1   : > { %931 = vmatmul.mubr.msk.f32.vlgmr.msra.gmra.mrb[6].mxu0 %vm122_vm1, %v720_v3 }
 0x57c   : > { %v449_v4 = vpop.f32.mrb[2].mxu0 }
 0x57d   : > { %454 = vrot.lane.b32.xlu1 %v449_v4, %s994_s26  ;;  %v912_v5 = vpop.f32.mrb[3].mxu0 }
 0x580   : > { %v621_v6 = vpop.f32.mrb[4].mxu0 }
 0x581   : > { %626 = vrot.lane.b32.xlu0 %v621_v6, %s995_s27  ;;  %v922_v7 = vpop.f32.mrb[5].mxu0 }
 0x584   : > { %v793_v8 = vpop.f32.mrb[6].mxu0 }
 0x585   : > { %798 = vrot.lane.b32.xlu1 %v793_v8, %s996_s28  ;;  %v932_v9 = vpop.f32.mrb[7].mxu0 }
 0x5ef   : > { %v455_v0 = vpop.permute.xlu1 %454 }
 0x5f0   : > { %458 = vst.msk [vmem:[%s1066_s22] sm:$0xff] %vm457_vm3, %v455_v0 }
 0x5f3   : > { %v627_v10 = vpop.permute.xlu0 %626 }
 0x5f4   : > { %630 = vst.msk [vmem:[%s1066_s22] sm:$0xff] %vm629_vm4, %v627_v10 }
 0x5f7   : > { %v799_v11 = vpop.permute.xlu1 %798 }
 0x5f8   : > { %802 = vst.msk [vmem:[%s1066_s22] sm:$0xff] %vm801_vm5, %v799_v11 }
 0x5f9 PF: > { %s11_s6 = sadd.s32 1, %s979_s6  }
 0x5fa   : > { %p8_p4 = scmp.ge.s32.totalorder %s11_s6, 4  }
 0x5fc   :  { %10 = sbr.rel (!%p8_p4) target bundleno = 1 (0x1), region = 54 }

// kernel: decoder_forward.23
= control target key start
LH: loop header
LB: loop body
LE: loop exit
PB: predicated region body
PF: predicated region fallthrough
CT: control target
= control target key end

     0   :  { %vm29_vm0 = vcmask 261120   ;;  %vm18_vm1 = vcmask 523264   ;;  %v165_v3 = vmov 0.0   ;;  %s221_s1 = inlined_call_operand.vmem [shape: f32[32,64], index: 1, kind: input, shape index: {}]   ;;  %s222_s0 = inlined_call_operand.vmem [shape: f32[16,32], index: 0, kind: input, shape index: {}]   ;;  %s223_s2 = inlined_call_operand.vmem [shape: f32[1,64], index: 2, kind: input, shape index: {}]   ;;  %s224_s3 = inlined_call_operand.vmem [shape: f32[16,64], index: 3, kind: output, shape index: {}]  }
   0x1   :  { %v25_v0 = vld [vmem:[%s221_s1] sm:$0xff]  ;;  %v26_v1 = vld [vmem:[%s221_s1 + $0x8] sm:$0xff]  ;;  %v27_v2 = vld [vmem:[%s221_s1 + $0x10] sm:$0xff]  ;;  %20 = vst.msk [vmem:[#allocation2 + $0x8] sm:$0xff] %vm18_vm1, %v165_v3 }
   0x2   :  { %19 = vst.msk [vmem:[#allocation2] sm:$0xff] %vm18_vm1, %v165_v3  ;;  %v156_v4 = vpack.c.bf16 %v26_v1, %v25_v0  ;;  %v28_v5 = vld [vmem:[%s221_s1 + $0x18] sm:$0xff]  ;;  %v21_v6 = vld [vmem:[%s222_s0] sm:$0xff]  ;;  %v22_v8 = vld [vmem:[%s222_s0 + $0x8] sm:$0xff] }
   0x3   :  { %v160_v7 = vpack.c.bf16 %v28_v5, %v27_v2  ;;  %153 = vmatprep.mubr.msk.f32.mxu0 %vm29_vm0, %v21_v6  ;;  %v138_v15 = vld [vmem:[%s223_s2] ss:$0 sm:$0xff] }
   0x4   :  { %157 = vmatprep.subr.bf16.mxu0 %v156_v4 }
   0x5   :  { %159 = vmatpush3.bf16.msra.mxu0 %v156_v4 }
   0x6   :  { %161 = vmatprep.subr.bf16.mxu0 %v160_v7 }
   0x8   :  { %v24_v9 = vld [vmem:[#allocation2 + $0x8] sm:$0xff] }
   0x9   :  { %163 = vmatpush3.bf16.msra.mxu0 %v160_v7  ;;  %v23_v10 = vld [vmem:[#allocation2] sm:$0xff] }
   0xc   :  { %154 = vmatmul.mubr.msk.f32.vlgmr.msra.gmra.mrb[0].mxu0 %vm29_vm0, %v22_v8 }
  0xdf   :  { %v155_v11 = vpop.f32.mrb[0].mxu0 }
  0xe0   :  { %v112_v12 = vadd.f32 %v155_v11, %v24_v9  ;;  %v102_v13 = vpop.f32.mrb[1].mxu0 }
  0xe1   :  { %v111_v14 = vadd.f32 %v102_v13, %v23_v10 }
  0xe2   :  { %115 = vst.msk [vmem:[#allocation2 + $0x8] sm:$0xff] %vm18_vm1, %v112_v12 }
  0xe3   :  { %114 = vst.msk [vmem:[#allocation2] sm:$0xff] %vm18_vm1, %v111_v14 }
  0xe9   :  { %v120_v16 = vld [vmem:[#allocation2 + $0x8] sm:$0xff] }
  0xea   :  { %v129_v17 = vadd.f32 %v138_v15, %v120_v16  ;;  %v119_v18 = vld [vmem:[#allocation2] sm:$0xff] }
  0xeb   :  { %v128_v19 = vadd.f32 %v138_v15, %v119_v18 }
  0xec   :  { %131 = vst.msk [vmem:[%s224_s3 + $0x8] sm:$0xff] %vm18_vm1, %v129_v17 }
  0xed   :  { %130 = vst.msk [vmem:[%s224_s3] sm:$0xff] %vm18_vm1, %v128_v19 }

// kernel: decoder_forward.24
= control target key start
LH: loop header
LB: loop body
LE: loop exit
PB: predicated region body
PF: predicated region fallthrough
CT: control target
= control target key end

     0   :  { %s1051_s9 = smov 0   ;;  %s1137_s0 = inlined_call_operand.vmem [shape: f32[2,8,32], index: 0, kind: input, shape index: {}]   ;;  %s1138_s1 = inlined_call_operand.vmem [shape: f32[2,8,64], index: 1, kind: input, shape index: {}]   ;;  %s1139_s2 = inlined_call_operand.vmem [shape: f32[2,8,32], index: 2, kind: output, shape index: {}]  }
   0x1 LB: > { %s902_s10 = sadd.s32 4294967295, %s1022_s9   ;;  %p906_p0 = scmp.ge.s32.totalorder %s1022_s9, 1  ;;  %s1022_s9 = sphi %s1051_s9, %s12_s9  }
   0x2   : > { %p120_p1 = scmp.lt.s32.totalorder %s1022_s9, 3 }
   0x4   : > { %p121_p2 = pnand %p906_p0, %p120_p1 }
   0x5   : > { %p144_p3 = scmp.lt.s32.totalorder (!%p121_p2), %s902_s10, 1  ;;  %v1024_v0 = vmov (!%p121_p2), 0.0   ;;  %vm1025_vm0 = vmmov (!%p121_p2), 0   ;;  %vm159_vm1 = vcmask (!%p121_p2), 64512   ;;  %s1026_s18 = smov (!%p121_p2), 96   ;;  %vm493_vm2 = vcmask (!%p121_p2), 130112  }
   0x6   : > { %124 = sbr.rel (%p121_p2) target bundleno = 1412 (0x584), region = 28  ;;  %940 = vmatprep.subr.mxu0 (!%p121_p2), %v1024_v0  ;;  %942 = vmatprep.mubr.msk.f32.mxu0 (!%p121_p2), %vm1025_vm0, %v1024_v0  ;;  %s1027_s19 = smov (!%p121_p2), 120   ;;  %vm664_vm3 = vcmask (!%p121_p2), 195712   ;;  %vm835_vm4 = vcmask (!%p121_p2), 261312  }
   0x7   : > { %945 = vmatprep.subr.mxu1 (!%p121_p2), %v1024_v0  ;;  %947 = vmatprep.mubr.msk.f32.mxu1 (!%p121_p2), %vm1025_vm0, %v1024_v0  ;;  %s1028_s20 = smov (!%p121_p2), 112   ;;  %s1029_s21 = smov (!%p121_p2), 104  }
   0x8   : > { %s1030_s25 = smov (!%p121_p2), 88   ;;  %s1031_s26 = smov (!%p121_p2), 72  }
   0x9   : > { %s1032_s27 = smov (!%p121_p2), 80   ;;  %s1033_s28 = smov (!%p121_p2), 8  }
   0xa   : > { %s1034_s29 = smov (!%p121_p2), 16   ;;  %s1035_s30 = smov (!%p121_p2), 24  }
   0xd   : > { %s1141_s10 = smov (!%p144_p3, %s902_s10), 1 }
   0xe   : > { %s1065_s11 = sshll.u32 %s1141_s10, 3 }
   0xf   : > { %s151_s14 = scalar_lea.vmem %s1138_s1, %s1065_s11  ;;  %s147_s17 = scalar_lea.vmem %s1137_s0, %s1065_s11 }
  0x10   : > { %v1075_v1 = vld [vmem:[%s151_s14] sm:$0xff]  ;;  %s1109_s24 = scalar_lea.vmem %s1139_s2, %s1065_s11 }
  0x11   : > { %v156_v2 = vld [vmem:[%s147_s17] sm:$0xff]  ;;  %941 = vmatpush3.xpose.msk.msra.mxu0 %vm159_vm1, %v1075_v1  ;;  %247 = vrot.lane.b32.xlu1 %v1075_v1, %s1026_s18 }
  0x12   : > { %v158_v3 = vmul.f32 0.35355338, %v156_v2  ;;  %955 = vmatprep.subr.mxu0 %v1024_v0 }
  0x14   : > { %943 = vmatmul.mubr.msk.f32.vlgmr.msra.gmra.mrb[0].mxu0 %vm159_vm1, %v158_v3 }
  0x15   : > { %957 = vmatprep.mubr.msk.f32.mxu0 %vm1025_vm0, %v1024_v0  ;;  %326 = vrot.lane.b32.xlu1 %v1075_v1, %s1027_s19 }
  0x19   : > { %497 = vrot.lane.b32.xlu1 %v1075_v1, %s1028_s20 }
  0x1d   : > { %495 = vrot.lane.b32.xlu1 %v158_v3, %s1028_s20 }
  0x21   : > { %668 = vrot.lane.b32.xlu1 %v1075_v1, %s1029_s21 }
  0x25   : > { %666 = vrot.lane.b32.xlu1 %v158_v3, %s1029_s21 }
  0x83   : > { %v248_v12 = vpop.permute.xlu1 %247 }
  0x84   : > { %946 = vmatpush3.msra.mxu1 %v248_v12 }
  0x85   : > { %950 = vmatprep.subr.mxu1 %v1024_v0 }
  0x87   : > { %v327_v13 = vpop.permute.xlu1 %326 }
  0x8b   : > { %v498_v15 = vpop.permute.xlu1 %497 }
  0x8f   : > { %v496_v17 = vpop.permute.xlu1 %495 }
  0x93   : > { %v669_v20 = vpop.permute.xlu1 %668 }
  0x97   : > { %v667_v21 = vpop.permute.xlu1 %666 }
  0xe7   : > { %v232_v4 = vpop.f32.mrb[0].mxu0 }
  0xe8   : > { %v944_v5 = vpop.f32.mrb[1].mxu0  ;;  %v236_v6 = vsel %vm159_vm1, %v232_v4, -inf }
  0xe9   : > { %237 = vmax.xlane.f32.xlu0 %v236_v6 }
 0x176   : > { %v238_v7 = vpop.xlane.xlu0 %237 }
 0x177   : > { %v239_v8 = vsub.f32 %v232_v4, %v238_v7 }
 0x179   : > { %v240_v9 = vmul.f32 1.442695, %v239_v8 }
 0x17b   : > { %1000 = vpow2.f32 %v240_v9 }
 0x185   : > { %v1001_v10 = vpop.eup %1000 }
 0x186   : > { %v242_v11 = vsel %vm159_vm1, %v1001_v10, 0.0 }
 0x187   : > { %243 = vadd.xlane.f32.xlu0 %v242_v11 }
 0x19d   : > { %324 = vrot.lane.b32.xlu0 %v158_v3, %s1027_s19 }
 0x214   : > { %v244_v14 = vpop.xlane.xlu0 %243 }
 0x215   : > { %1002 = vrcp.f32 %v244_v14 }
 0x218   : > { %v325_v19 = vpop.permute.xlu0 %324 }
 0x21f   : > { %v1003_v16 = vpop.eup %1002 }
 0x220   : > { %v246_v18 = vmul.f32 %v1003_v16, %v1001_v10 }
 0x222   : > { %948 = vmatmul.mubr.msk.f32.vlgmr.msra.gmra.mrb[0].mxu1 %vm159_vm1, %v246_v18 }
 0x223   : > { %951 = vmatpush3.xpose.msk.msra.mxu1 %vm159_vm1, %v327_v13  ;;  %952 = vmatprep.mubr.msk.f32.mxu1 %vm1025_vm0, %v1024_v0 }
 0x224   : > { %960 = vmatprep.subr.mxu1 %v1024_v0 }
 0x226   : > { %953 = vmatmul.mubr.msk.f32.vlgmr.msra.gmra.mrb[2].mxu1 %vm159_vm1, %v325_v19 }
 0x227   : > { %961 = vmatpush3.xpose.msk.msra.mxu1 %vm159_vm1, %v498_v15  ;;  %962 = vmatprep.mubr.msk.f32.mxu1 %vm1025_vm0, %v1024_v0 }
 0x228   : > { %970 = vmatprep.subr.mxu1 %v1024_v0 }
 0x22a   : > { %963 = vmatmul.mubr.msk.f32.vlgmr.msra.gmra.mrb[4].mxu1 %vm159_vm1, %v496_v17 }
 0x22b   : > { %971 = vmatpush3.xpose.msk.msra.mxu1 %vm159_vm1, %v669_v20  ;;  %972 = vmatprep.mubr.msk.f32.mxu1 %vm1025_vm0, %v1024_v0 }
 0x22e   : > { %973 = vmatmul.mubr.msk.f32.vlgmr.msra.gmra.mrb[6].mxu1 %vm159_vm1, %v667_v21 }
 0x2f5   : > { %v319_v22 = vpop.f32.mrb[0].mxu1 }
 0x2f6   : > { %323 = vst.msk [vmem:[%s1109_s24] sm:$0xff] %vm159_vm1, %v319_v22  ;;  %v949_v23 = vpop.f32.mrb[1].mxu1 }
 0x2f9   : > { %v398_v24 = vpop.f32.mrb[2].mxu1 }
 0x2fa   : > { %v954_v25 = vpop.f32.mrb[3].mxu1  ;;  %v402_v26 = vsel %vm159_vm1, %v398_v24, -inf }
 0x2fb   : > { %403 = vmax.xlane.f32.xlu1 %v402_v26 }
 0x2fd   : > { %v569_v27 = vpop.f32.mrb[4].mxu1 }
 0x2fe   : > { %v964_v28 = vpop.f32.mrb[5].mxu1  ;;  %v573_v29 = vsel %vm159_vm1, %v569_v27, -inf }
 0x2ff   : > { %574 = vmax.xlane.f32.xlu0 %v573_v29 }
 0x301   : > { %v740_v30 = vpop.f32.mrb[6].mxu1 }
 0x302   : > { %v974_v31 = vpop.f32.mrb[7].mxu1  ;;  %v744_v32 = vsel %vm159_vm1, %v740_v30, -inf }
 0x303   : > { %745 = vmax.xlane.f32.xlu1 %v744_v32 }
 0x314   : > { %413 = vrot.lane.b32.xlu1 %v1075_v1, %s1030_s25 }
 0x388   : > { %v404_v33 = vpop.xlane.xlu1 %403 }
 0x389   : > { %v405_v34 = vsub.f32 %v398_v24, %v404_v33 }
 0x38b   : > { %v406_v35 = vmul.f32 1.442695, %v405_v34 }
 0x38c   : > { %v575_v36 = vpop.xlane.xlu0 %574 }
 0x38d   : > { %1004 = vpow2.f32 %v406_v35  ;;  %v576_v37 = vsub.f32 %v569_v27, %v575_v36 }
 0x38f   : > { %v577_v38 = vmul.f32 1.442695, %v576_v37 }
 0x390   : > { %v746_v39 = vpop.xlane.xlu1 %745 }
 0x391   : > { %1006 = vpow2.f32 %v577_v38  ;;  %v747_v40 = vsub.f32 %v740_v30, %v746_v39 }
 0x393   : > { %v748_v41 = vmul.f32 1.442695, %v747_v40 }
 0x394   : > { %v414_v42 = vpop.permute.xlu1 %413 }
 0x395   : > { %1008 = vpow2.f32 %v748_v41  ;;  %956 = vmatpush3.msra.mxu0 %v414_v42 }
 0x396   : > { %965 = vmatprep.subr.mxu0 %v1024_v0 }
 0x397   : > { %v1005_v43 = vpop.eup %1004 }
 0x398   : > { %v408_v44 = vsel %vm159_vm1, %v1005_v43, 0.0 }
 0x399   : > { %409 = vadd.xlane.f32.xlu0 %v408_v44 }
 0x39b   : > { %v1007_v45 = vpop.eup %1006 }
 0x39c   : > { %v579_v46 = vsel %vm159_vm1, %v1007_v45, 0.0 }
 0x39d   : > { %580 = vadd.xlane.f32.xlu1 %v579_v46 }
 0x39f   : > { %v1009_v47 = vpop.eup %1008 }
 0x3a0   : > { %v750_v48 = vsel %vm159_vm1, %v1009_v47, 0.0 }
 0x3a1   : > { %751 = vadd.xlane.f32.xlu0 %v750_v48 }
 0x3ae   : > { %755 = vrot.lane.b32.xlu1 %v1075_v1, %s1031_s26 }
 0x3b7   : > { %584 = vrot.lane.b32.xlu0 %v1075_v1, %s1032_s27 }
 0x426   : > { %v410_v49 = vpop.xlane.xlu0 %409 }
 0x427   : > { %1010 = vrcp.f32 %v410_v49 }
 0x42a   : > { %v581_v50 = vpop.xlane.xlu1 %580 }
 0x42b   : > { %1012 = vrcp.f32 %v581_v50 }
 0x42e   : > { %v752_v51 = vpop.xlane.xlu0 %751  ;;  %v756_v57 = vpop.permute.xlu1 %755 }
 0x42f   : > { %1014 = vrcp.f32 %v752_v51 }
 0x431   : > { %v1011_v52 = vpop.eup %1010 }
 0x432   : > { %v412_v53 = vmul.f32 %v1011_v52, %v1005_v43  ;;  %v585_v54 = vpop.permute.xlu0 %584 }
 0x434   : > { %958 = vmatmul.mubr.msk.f32.vlgmr.msra.gmra.mrb[2].mxu0 %vm159_vm1, %v412_v53 }
 0x435   : > { %v1013_v55 = vpop.eup %1012  ;;  %966 = vmatpush3.msra.mxu0 %v585_v54  ;;  %967 = vmatprep.mubr.msk.f32.mxu0 %vm1025_vm0, %v1024_v0 }
 0x436   : > { %v583_v56 = vmul.f32 %v1013_v55, %v1007_v45  ;;  %975 = vmatprep.subr.mxu0 %v1024_v0 }
 0x438   : > { %968 = vmatmul.mubr.msk.f32.vlgmr.msra.gmra.mrb[4].mxu0 %vm159_vm1, %v583_v56 }
 0x439   : > { %v1015_v58 = vpop.eup %1014  ;;  %976 = vmatpush3.msra.mxu0 %v756_v57  ;;  %977 = vmatprep.mubr.msk.f32.mxu0 %vm1025_vm0, %v1024_v0 }
 0x43a   : > { %v754_v59 = vmul.f32 %v1015_v58, %v1009_v47 }
 0x43c   : > { %978 = vmatmul.mubr.msk.f32.vlgmr.msra.gmra.mrb[6].mxu0 %vm159_vm1, %v754_v59 }
 0x507   : > { %v485_v60 = vpop.f32.mrb[2].mxu0 }
 0x508   : > { %490 = vrot.lane.b32.xlu1 %v485_v60, %s1033_s28  ;;  %v959_v61 = vpop.f32.mrb[3].mxu0 }
 0x50b   : > { %v656_v62 = vpop.f32.mrb[4].mxu0 }
 0x50c   : > { %661 = vrot.lane.b32.xlu0 %v656_v62, %s1034_s29  ;;  %v969_v63 = vpop.f32.mrb[5].mxu0 }
 0x50f   : > { %v827_v1 = vpop.f32.mrb[6].mxu0 }
 0x510   : > { %832 = vrot.lane.b32.xlu1 %v827_v1, %s1035_s30  ;;  %v979_v2 = vpop.f32.mrb[7].mxu0 }
 0x57a   : > { %v491_v0 = vpop.permute.xlu1 %490 }
 0x57b   : > { %494 = vst.msk [vmem:[%s1109_s24] sm:$0xff] %vm493_vm2, %v491_v0 }
 0x57e   : > { %v662_v3 = vpop.permute.xlu0 %661 }
 0x57f   : > { %665 = vst.msk [vmem:[%s1109_s24] sm:$0xff] %vm664_vm3, %v662_v3 }
 0x582   : > { %v833_v4 = vpop.permute.xlu1 %832 }
 0x583   : > { %836 = vst.msk [vmem:[%s1109_s24] sm:$0xff] %vm835_vm4, %v833_v4 }
 0x584 PF: > { %s12_s9 = sadd.s32 1, %s1022_s9  }
 0x585   : > { %p9_p4 = scmp.ge.s32.totalorder %s12_s9, 4  }
 0x587   :  { %11 = sbr.rel (!%p9_p4) target bundleno = 1 (0x1), region = 61 }

// kernel: decoder_forward.27
= control target key start
LH: loop header
LB: loop body
LE: loop exit
PB: predicated region body
PF: predicated region fallthrough
CT: control target
= control target key end

     0   :  { %vm21_vm0 = vcmask 261120   ;;  %v235_v3 = vmov 0.0   ;;  %s336_s1 = inlined_call_operand.vmem [shape: f32[128,32], index: 1, kind: input, shape index: {}]   ;;  %s337_s0 = inlined_call_operand.vmem [shape: f32[16,128], index: 0, kind: input, shape index: {}]   ;;  %s338_s2 = inlined_call_operand.vmem [shape: f32[1,32], index: 2, kind: input, shape index: {}]   ;;  %s339_s3 = inlined_call_operand.vmem [shape: f32[16,32], index: 3, kind: input, shape index: {}]   ;;  %s340_s4 = inlined_call_operand.vmem [shape: f32[16,32], index: 4, kind: output, shape index: {}]  }
   0x1   :  { %v28_v0 = vld [vmem:[%s336_s1] sm:$0xff]  ;;  %v29_v1 = vld [vmem:[%s336_s1 + $0x8] sm:$0xff]  ;;  %v30_v2 = vld [vmem:[%s336_s1 + $0x10] sm:$0xff]  ;;  %23 = vst.msk [vmem:[#allocation2 + $0x8] sm:$0xff] %vm21_vm0, %v235_v3 }
   0x2   :  { %22 = vst.msk [vmem:[#allocation2] sm:$0xff] %vm21_vm0, %v235_v3  ;;  %v202_v4 = vpack.c.bf16 %v29_v1, %v28_v0  ;;  %v31_v5 = vld [vmem:[%s336_s1 + $0x18] sm:$0xff]  ;;  %v32_v7 = vld [vmem:[%s336_s1 + $0x20] sm:$0xff]  ;;  %v33_v8 = vld [vmem:[%s336_s1 + $0x28] sm:$0xff] }
   0x3   :  { %v206_v6 = vpack.c.bf16 %v31_v5, %v30_v2  ;;  %v210_v9 = vpack.c.bf16 %v33_v8, %v32_v7  ;;  %v24_v10 = vld [vmem:[%s337_s0] sm:$0xff]  ;;  %v34_v11 = vld [vmem:[%s336_s1 + $0x30] sm:$0xff]  ;;  %v35_v12 = vld [vmem:[%s336_s1 + $0x38] sm:$0xff] }
   0x4   :  { %203 = vmatprep.subr.bf16.mxu0 %v202_v4  ;;  %199 = vmatprep.mubr.f32.mxu0 %v24_v10  ;;  %v214_v13 = vpack.c.bf16 %v35_v12, %v34_v11  ;;  %v36_v14 = vld [vmem:[%s336_s1 + $0x40] sm:$0xff]  ;;  %v37_v15 = vld [vmem:[%s336_s1 + $0x48] sm:$0xff]  ;;  %v38_v17 = vld [vmem:[%s336_s1 + $0x50] sm:$0xff] }
   0x5   :  { %205 = vmatpush3.bf16.msra.mxu0 %v202_v4  ;;  %v218_v16 = vpack.c.bf16 %v37_v15, %v36_v14  ;;  %v39_v18 = vld [vmem:[%s336_s1 + $0x58] sm:$0xff]  ;;  %v40_v20 = vld [vmem:[%s336_s1 + $0x60] sm:$0xff]  ;;  %v41_v21 = vld [vmem:[%s336_s1 + $0x68] sm:$0xff] }
   0x6   :  { %207 = vmatprep.subr.bf16.mxu0 %v206_v6  ;;  %v222_v19 = vpack.c.bf16 %v39_v18, %v38_v17  ;;  %v226_v22 = vpack.c.bf16 %v41_v21, %v40_v20  ;;  %v42_v23 = vld [vmem:[%s336_s1 + $0x70] sm:$0xff]  ;;  %v43_v24 = vld [vmem:[%s336_s1 + $0x78] sm:$0xff]  ;;  %v25_v26 = vld [vmem:[%s337_s0 + $0x8] sm:$0xff] }
   0x7   :  { %v230_v25 = vpack.c.bf16 %v43_v24, %v42_v23  ;;  %v148_v33 = vld [vmem:[%s338_s2] ss:$0 sm:$0xff]  ;;  %v139_v35 = vld [vmem:[%s339_s3 + $0x8] sm:$0xff] }
   0x8   :  { %v27_v27 = vld [vmem:[#allocation2 + $0x8] sm:$0xff]  ;;  %v138_v37 = vld [vmem:[%s339_s3] sm:$0xff] }
   0x9   :  { %209 = vmatpush3.bf16.msra.mxu0 %v206_v6  ;;  %v26_v28 = vld [vmem:[#allocation2] sm:$0xff] }
   0xa   :  { %211 = vmatprep.subr.bf16.mxu0 %v210_v9 }
   0xd   :  { %213 = vmatpush3.bf16.msra.mxu0 %v210_v9 }
   0xe   :  { %215 = vmatprep.subr.bf16.mxu0 %v214_v13 }
  0x11   :  { %217 = vmatpush3.bf16.msra.mxu0 %v214_v13 }
  0x12   :  { %219 = vmatprep.subr.bf16.mxu0 %v218_v16 }
  0x15   :  { %221 = vmatpush3.bf16.msra.mxu0 %v218_v16 }
  0x16   :  { %223 = vmatprep.subr.bf16.mxu0 %v222_v19 }
  0x19   :  { %225 = vmatpush3.bf16.msra.mxu0 %v222_v19 }
  0x1a   :  { %227 = vmatprep.subr.bf16.mxu0 %v226_v22 }
  0x1d   :  { %229 = vmatpush3.bf16.msra.mxu0 %v226_v22 }
  0x1e   :  { %231 = vmatprep.subr.bf16.mxu0 %v230_v25 }
  0x21   :  { %233 = vmatpush3.bf16.msra.mxu0 %v230_v25 }
  0x24   :  { %200 = vmatmul.mubr.f32.vlgmr.msra.gmra.mrb[0].mxu0 %v25_v26 }
  0xf7   :  { %v201_v29 = vpop.f32.mrb[0].mxu0 }
  0xf8   :  { %v120_v30 = vadd.f32 %v201_v29, %v27_v27  ;;  %v110_v31 = vpop.f32.mrb[1].mxu0 }
  0xf9   :  { %v119_v32 = vadd.f32 %v110_v31, %v26_v28 }
  0xfa   :  { %123 = vst.msk [vmem:[#allocation2 + $0x8] sm:$0xff] %vm21_vm0, %v120_v30 }
  0xfb   :  { %122 = vst.msk [vmem:[#allocation2] sm:$0xff] %vm21_vm0, %v119_v32 }
 0x101   :  { %v128_v34 = vld [vmem:[#allocation2 + $0x8] sm:$0xff] }
 0x102   :  { %v137_v36 = vadd.f32 %v148_v33, %v128_v34  ;;  %v127_v38 = vld [vmem:[#allocation2] sm:$0xff] }
 0x103   :  { %v136_v39 = vadd.f32 %v148_v33, %v127_v38 }
 0x104   :  { %v141_v40 = vadd.f32 %v139_v35, %v137_v36 }
 0x105   :  { %v140_v41 = vadd.f32 %v138_v37, %v136_v39 }
 0x106   :  { %143 = vst.msk [vmem:[%s340_s4 + $0x8] sm:$0xff] %vm21_vm0, %v141_v40 }
 0x107   :  { %142 = vst.msk [vmem:[%s340_s4] sm:$0xff] %vm21_vm0, %v140_v41 }

// kernel: decoder_forward.26
= control target key start
LH: loop header
LB: loop body
LE: loop exit
PB: predicated region body
PF: predicated region fallthrough
CT: control target
= control target key end

     0   :  { %vm28_vm0 = vcmask 261120   ;;  %s310_s0 = inlined_call_operand.vmem [shape: f32[16,32], index: 0, kind: input, shape index: {}]   ;;  %s311_s1 = inlined_call_operand.vmem [shape: f32[32,128], index: 1, kind: input, shape index: {}]   ;;  %s312_s3 = inlined_call_operand.vmem [shape: f32[1,32], index: 3, kind: input, shape index: {}]   ;;  %s313_s4 = inlined_call_operand.vmem [shape: f32[1,32], index: 4, kind: input, shape index: {}]   ;;  %s314_s2 = inlined_call_operand.vmem [shape: f32[1,128], index: 2, kind: input, shape index: {}]   ;;  %s315_s5 = inlined_call_operand.vmem [shape: f32[16,128], index: 5, kind: output, shape index: {}]  }
   0x1   :  { %v26_v0 = vld [vmem:[%s310_s0] sm:$0xff]  ;;  %v27_v1 = vld [vmem:[%s310_s0 + $0x8] sm:$0xff]  ;;  %v78_v16 = vld [vmem:[%s311_s1 + $0x10] sm:$0xff] }
   0x2   :  { %v29_v2 = vsel %vm28_vm0, %v26_v0, 0.0  ;;  %v32_v3 = vsel %vm28_vm0, %v27_v1, 0.0  ;;  %v76_v14 = vld [vmem:[%s311_s1] sm:$0xff]  ;;  %v77_v15 = vld [vmem:[%s311_s1 + $0x8] sm:$0xff]  ;;  %v79_v18 = vld [vmem:[%s311_s1 + $0x18] sm:$0xff] }
   0x3   :  { %30 = vadd.xlane.f32.xlu0 %v29_v2  ;;  %v225_v17 = vpack.c.bf16 %v77_v15, %v76_v14  ;;  %v229_v19 = vpack.c.bf16 %v79_v18, %v78_v16  ;;  %v203_v27 = vld [vmem:[%s312_s3] ss:$0 sm:$0xff] }
   0x4   :  { %v204_v29 = vld [vmem:[%s313_s4] ss:$0 sm:$0xff] }
   0x5   :  { %226 = vmatprep.subr.bf16.mxu0 %v225_v17  ;;  %v207_v36 = vld [vmem:[%s314_s2] ss:$0 sm:$0xff] }
   0x6   :  { %228 = vmatpush3.bf16.msra.mxu0 %v225_v17 }
   0x7   :  { %33 = vadd.xlane.f32.xlu0 %v32_v3  ;;  %230 = vmatprep.subr.bf16.mxu0 %v229_v19 }
   0xa   :  { %232 = vmatpush3.bf16.msra.mxu0 %v229_v19 }
  0x90   :  { %v31_v4 = vpop.xlane.xlu0 %30 }
  0x91   :  { %v36_v5 = vmul.f32 0.03125, %v31_v4 }
  0x93   :  { %v38_v6 = vsub.f32 %v26_v0, %v36_v5 }
  0x94   :  { %v34_v7 = vpop.xlane.xlu0 %33 }
  0x95   :  { %v37_v8 = vmul.f32 0.03125, %v34_v7  ;;  %v40_v9 = vmul.f32 %v38_v6, %v38_v6 }
  0x97   :  { %v39_v10 = vsub.f32 %v27_v1, %v37_v8  ;;  %v42_v11 = vsel %vm28_vm0, %v40_v9, 0.0 }
  0x98   :  { %43 = vadd.xlane.f32.xlu1 %v42_v11 }
  0x99   :  { %v41_v12 = vmul.f32 %v39_v10, %v39_v10 }
  0x9b   :  { %v45_v13 = vsel %vm28_vm0, %v41_v12, 0.0 }
  0x9c   :  { %46 = vadd.xlane.f32.xlu1 %v45_v13 }
 0x125   :  { %v44_v20 = vpop.xlane.xlu1 %43 }
 0x126   :  { %v48_v21 = vmul.f32 0.03125, %v44_v20 }
 0x128   :  { %v50_v22 = vadd.f32 1e-05, %v48_v21 }
 0x129   :  { %v47_v23 = vpop.xlane.xlu1 %46 }
 0x12a   :  { %233 = vrsqrt.f32 %v50_v22  ;;  %v49_v24 = vmul.f32 0.03125, %v47_v23 }
 0x12c   :  { %v51_v25 = vadd.f32 1e-05, %v49_v24 }
 0x12e   :  { %235 = vrsqrt.f32 %v51_v25 }
 0x134   :  { %v234_v26 = vpop.eup %233 }
 0x135   :  { %v54_v28 = vmul.f32 %v234_v26, %v38_v6 }
 0x137   :  { %v63_v30 = vmul.f32 %v203_v27, %v54_v28 }
 0x138   :  { %v236_v31 = vpop.eup %235 }
 0x139   :  { %v55_v32 = vmul.f32 %v236_v31, %v39_v10  ;;  %v72_v33 = vadd.f32 %v204_v29, %v63_v30 }
 0x13b   :  { %v64_v34 = vmul.f32 %v203_v27, %v55_v32  ;;  %222 = vmatprep.mubr.msk.f32.mxu0 %vm28_vm0, %v72_v33 }
 0x13d   :  { %v73_v35 = vadd.f32 %v204_v29, %v64_v34 }
 0x13f   :  { %223 = vmatmul.mubr.msk.f32.vlgmr.msra.gmra.mrb[0].mxu0 %vm28_vm0, %v73_v35 }
 0x212   :  { %v224_v37 = vpop.f32.mrb[0].mxu0 }
 0x213   :  { %v178_v38 = vadd.f32 %v224_v37, %v207_v36  ;;  %v152_v39 = vpop.f32.mrb[1].mxu0 }
 0x214   :  { %v177_v40 = vadd.f32 %v207_v36, %v152_v39 }
 0x215   :  { %v180_v41 = vmul.f32 %v178_v38, %v178_v38 }
 0x216   :  { %v179_v42 = vmul.f32 %v177_v40, %v177_v40 }
 0x217   :  { %v182_v43 = vmul.f32 %v180_v41, %v178_v38 }
 0x218   :  { %v181_v44 = vmul.f32 %v179_v42, %v177_v40 }
 0x219   :  { %v184_v45 = vmul.f32 0.044715, %v182_v43 }
 0x21a   :  { %v183_v46 = vmul.f32 0.044715, %v181_v44 }
 0x21b   :  { %v186_v47 = vadd.f32 %v184_v45, %v178_v38 }
 0x21c   :  { %v185_v48 = vadd.f32 %v183_v46, %v177_v40 }
 0x21d   :  { %v188_v49 = vmul.f32 0.7978846, %v186_v47 }
 0x21e   :  { %v187_v50 = vmul.f32 0.7978846, %v185_v48 }
 0x21f   :  { %237 = vtanh.f32 %v188_v49 }
 0x220   :  { %239 = vtanh.f32 %v187_v50 }
 0x229   :  { %v238_v51 = vpop.eup %237 }
 0x22a   :  { %v240_v52 = vpop.eup %239  ;;  %v192_v53 = vadd.f32 1.0, %v238_v51 }
 0x22b   :  { %v191_v54 = vadd.f32 1.0, %v240_v52 }
 0x22c   :  { %v194_v55 = vmul.f32 0.5, %v192_v53 }
 0x22d   :  { %v193_v56 = vmul.f32 0.5, %v191_v54 }
 0x22e   :  { %v196_v57 = vmul.f32 %v194_v55, %v178_v38 }
 0x22f   :  { %v195_v58 = vmul.f32 %v193_v56, %v177_v40 }
 0x230   :  { %198 = vst [vmem:[%s315_s5 + $0x8] sm:$0xff] %v196_v57 }
 0x231   :  { %197 = vst [vmem:[%s315_s5] sm:$0xff] %v195_v58 }

// kernel: decoder_forward.37
= control target key start
LH: loop header
LB: loop body
LE: loop exit
PB: predicated region body
PF: predicated region fallthrough
CT: control target
= control target key end

     0   :  { %vm17_vm0 = vcmask 261120   ;;  %s167_s0 = inlined_call_operand.vmem [shape: f32[16,32], index: 0, kind: input, shape index: {}]   ;;  %s168_s1 = inlined_call_operand.vmem [shape: f32[1,32], index: 1, kind: input, shape index: {}]   ;;  %s169_s2 = inlined_call_operand.vmem [shape: f32[1,32], index: 2, kind: input, shape index: {}]   ;;  %s170_s3 = inlined_call_operand.hbm [shape: f32[16,32], index: 3, kind: output, shape index: {}]  }
   0x1   :  { %v15_v0 = vld [vmem:[%s167_s0] sm:$0xff]  ;;  %v16_v1 = vld [vmem:[%s167_s0 + $0x8] sm:$0xff] }
   0x2   :  { %8 = vsyncpa [#allocation3], 0  ;;  %v18_v2 = vsel %vm17_vm0, %v15_v0, 0.0  ;;  %v21_v3 = vsel %vm17_vm0, %v16_v1, 0.0  ;;  %v81_v21 = vld [vmem:[%s168_s1] ss:$0 sm:$0xff] }
   0x3   :  { %19 = vadd.xlane.f32.xlu0 %v18_v2  ;;  %v82_v23 = vld [vmem:[%s169_s2] ss:$0 sm:$0xff]  ;;  %s114_s19 = smov [#allocation2]  }
   0x4   :  { %s70_s20 = sshll.u32 %s114_s19, 4  ;;  %s71_s20 = int_to_ptr.vmem [resolvable:$true] %s70_s20 }
   0x5   :  { %s90_s21 = scalar_lea.vmem %s71_s20, 256  ;;  %p95_p1 = scmp.lt.s32.totalorder %s71_s20, %s71_s20 }
   0x6   :  { %p91_p0 = scmp.ne.s32.totalorder %s71_s20, %s90_s21  ;;  %p96_p2 = scmp.lt.s32.totalorder %s90_s21, %s90_s21 }
   0x7   :  { %22 = vadd.xlane.f32.xlu0 %v21_v3 }
   0x8   :  { %p97_p3 = por %p96_p2, %p95_p1 }
   0xa   :  { %p98_p4 = pnand %p97_p3, %p91_p0 }
  0x90   :  { %v20_v4 = vpop.xlane.xlu0 %19 }
  0x91   :  { %v25_v5 = vmul.f32 0.03125, %v20_v4 }
  0x93   :  { %v27_v6 = vsub.f32 %v15_v0, %v25_v5 }
  0x94   :  { %v23_v7 = vpop.xlane.xlu0 %22 }
  0x95   :  { %v26_v8 = vmul.f32 0.03125, %v23_v7  ;;  %v29_v9 = vmul.f32 %v27_v6, %v27_v6 }
  0x97   :  { %v28_v10 = vsub.f32 %v16_v1, %v26_v8  ;;  %v31_v11 = vsel %vm17_vm0, %v29_v9, 0.0 }
  0x98   :  { %32 = vadd.xlane.f32.xlu1 %v31_v11 }
  0x99   :  { %v30_v12 = vmul.f32 %v28_v10, %v28_v10 }
  0x9b   :  { %v34_v13 = vsel %vm17_vm0, %v30_v12, 0.0 }
  0x9c   :  { %35 = vadd.xlane.f32.xlu1 %v34_v13 }
 0x125   :  { %v33_v14 = vpop.xlane.xlu1 %32 }
 0x126   :  { %v37_v15 = vmul.f32 0.03125, %v33_v14 }
 0x128   :  { %v39_v16 = vadd.f32 1e-05, %v37_v15 }
 0x129   :  { %v36_v17 = vpop.xlane.xlu1 %35 }
 0x12a   :  { %86 = vrsqrt.f32 %v39_v16  ;;  %v38_v18 = vmul.f32 0.03125, %v36_v17 }
 0x12c   :  { %v40_v19 = vadd.f32 1e-05, %v38_v18 }
 0x12e   :  { %88 = vrsqrt.f32 %v40_v19 }
 0x134   :  { %v87_v20 = vpop.eup %86 }
 0x135   :  { %v43_v22 = vmul.f32 %v87_v20, %v27_v6 }
 0x137   :  { %v52_v24 = vmul.f32 %v81_v21, %v43_v22 }
 0x138   :  { %v89_v25 = vpop.eup %88 }
 0x139   :  { %v44_v26 = vmul.f32 %v89_v25, %v28_v10  ;;  %v61_v27 = vadd.f32 %v82_v23, %v52_v24 }
 0x13b   :  { %v53_v28 = vmul.f32 %v81_v21, %v44_v26  ;;  %63 = vst.msk [vmem:[#allocation2] sm:$0xff] %vm17_vm0, %v61_v27 }
 0x13d   :  { %v62_v29 = vadd.f32 %v82_v23, %v53_v28 }
 0x13f   :  { %64 = vst.msk [vmem:[#allocation2 + $0x8] sm:$0xff] %vm17_vm0, %v62_v29 }
 0x140   :  { %101 = shalt.err (!%p98_p4)
}
 0x141   :  { %s102_s22 = scalar_lea.hbm %s170_s3, 256 }
 0x142   :  { %p103_p5 = scmp.ne.s32.totalorder %s170_s3, %s102_s22  ;;  %p106_p6 = scmp.lt.u32.totalorder %s102_s22, %s170_s3 }
 0x144   :  { %p108_p7 = pnand %p106_p6, %p103_p5 }
 0x146   :  { %111 = shalt.err (!%p108_p7)
}
 0x147   :  { %s115_s27 = smov 128   ;;  %s116_s28 = smov 8  }
 0x148   :  { %76 = dma.vmem_to_hbm [thread:$0]  %s71_s20, 256, %s170_s3, [#allocation3], %s115_s27, %s115_s27, %s116_s28  }
 0x149   :  { %112 = dma.done.wait [#allocation3], 256  }
 0x14a   :  { %113 = vsyncadd [#allocation3], 4294967040 }
 0x14b   :  { %80 = vsyncpa [#allocation3], 1 }

</bundles_post_ra>
